<compile_context>
chip_gen: v5e
topology: v5e:2x2
jax: 0.10.0
libtpu: 0.0.40
codegen_flags: <defaults>
</compile_context>

<pallas_src>
import functools

import jax
import jax.numpy as jnp
from jax.experimental import pallas as pl
from jax.experimental.pallas import tpu as pltpu


# ---------------------------------------------------------------------------
# Packed-weight layout inside the single (8, 128) f32 tile (rows 0..3 = out dim)
# ---------------------------------------------------------------------------
# cols  0:2   W_ih_up  (4,2)      cols 17:21  W2       (4,4)
# cols  2:6   W_hh_up  (4,4)      col  21     b2       (4,1)
# col   6     b_up     (4,1)      cols 22:26  W_ih_dn  (4,4)
# cols  8:12  W1[:, :4] (obs)     cols 26:30  W_hh_dn  (4,4)
# cols 12:16  W1[:, 4:] (h)       col  30     b_dn     (4,1)
# col  16     b1       (4,1)      col  31     w_out[:4] as column
#                                 [0,32] w_out[4]   [0,33] b_out


def rec_policy_kernel(w_ref, x_ref, out_ref):
    W = w_ref[...]                       # (8, 128): one vreg, resident across the grid
    x = x_ref[...]                       # (18, TILE_B): lane-dense batch tile

    obs = x[0:4, :]                      # (4, B)

    w_ih_up = W[0:4, 0:2]
    w_hh_up = W[0:4, 2:6]
    b_up    = W[0:4, 6:7]
    w1_obs  = W[0:4, 8:12]
    w1_h    = W[0:4, 12:16]
    b1      = W[0:4, 16:17]
    w2      = W[0:4, 17:21]
    b2      = W[0:4, 21:22]
    w_ih_dn = W[0:4, 22:26]
    w_hh_dn = W[0:4, 26:30]
    b_dn    = W[0:4, 30:31]
    w_out_h = W[0:4, 31:32]
    w_out_j = W[0:1, 32:33]
    b_out   = W[0:1, 33:34]

    def matvec(w, v):
        """(4,K)[out,in] @ (K,B) as rank-1 VPU broadcasts — keeps the MXU out of the chain."""
        acc = w[:, 0:1] * v[0:1, :]
        for k in range(1, w.shape[1]):
            acc = acc + w[:, k:k + 1] * v[k:k + 1, :]
        return acc

    # ---- hoisted, h-independent work (parallel; overlaps the DMA pipeline) -------------
    # up-pass input projections + (pre-summed) bias: one (4,B) slab per joint
    pre_up = [w_ih_up[:, 0:1] * x[4 + i:5 + i, :]
              + w_ih_up[:, 1:2] * x[11 + i:12 + i, :]
              + b_up
              for i in range(7)]
    # fc_out's j-term + bias: one (1,B) row per joint
    out_const = [w_out_j * x[4 + i:5 + i, :] + b_out for i in range(7)]

    # ---- upward recurrence: i = 6 .. 0, h starts at zero --------------------------------
    h = jnp.tanh(pre_up[6])              # h==0 so the W_hh term vanishes on the first step
    h_up = [None] * 7
    h_up[6] = h
    for i in range(5, -1, -1):
        h = jnp.tanh(matvec(w_hh_up, h) + pre_up[i])
        h_up[i] = h

    # ---- obs head: tanh(fc2(tanh(fc1(cat(obs, h))))) ------------------------------------
    h = jnp.tanh(matvec(w1_obs, obs) + matvec(w1_h, h) + b1)
    h = jnp.tanh(matvec(w2, h) + b2)

    # ---- hoisted r_down input projections from the saved up states (only 6 needed) ------
    d_in = [matvec(w_ih_dn, h_up[i]) + b_dn for i in range(6)]

    # ---- downward pass: emit action rows, then advance; single dense store at the end ---
    acts = []
    for i in range(7):
        acts.append(jnp.sum(w_out_h * h, axis=0, keepdims=True) + out_const[i])   # (1, B)
        if i < 6:
            h = jnp.tanh(matvec(w_hh_dn, h) + d_in[i])
    out_ref[...] = jnp.concatenate(acts, axis=0)                                  # (7, B)


# ---------------------------------------------------------------------------
# Wrapper: pad batch, transpose to batch-on-lanes, tile with a parallel grid
# ---------------------------------------------------------------------------
def _round_up(n, m):
    return ((n + m - 1) // m) * m


@functools.partial(jax.jit, static_argnames=("tile_b",))
def rec_policy_forward(x, wpack, *, tile_b=1024):
    B = x.shape[0]
    tile_b = min(tile_b, _round_up(B, 128))          # don't over-pad tiny batches
    b_pad = _round_up(B, tile_b)

    x_t = jnp.pad(x.astype(jnp.float32), ((0, b_pad - B), (0, 0))).T    # (18, B_pad)

    out_t = pl.pallas_call(
        rec_policy_kernel,
        out_shape=jax.ShapeDtypeStruct((7, b_pad), jnp.float32),
        grid=(b_pad // tile_b,),
        in_specs=[
            pl.BlockSpec((8, 128), lambda i: (0, 0)),        # packed weights: fetched once
            pl.BlockSpec((18, tile_b), lambda i: (0, i)),    # x tile, lane-dense
        ],
        out_specs=pl.BlockSpec((7, tile_b), lambda i: (0, i)),
        compiler_params=pltpu.CompilerParams(dimension_semantics=("parallel",)),
    )(wpack, x_t)

    return out_t[:, :B].T                                    # (B, 7)


# ---------------------------------------------------------------------------
# Parameters (PyTorch [out, in] orientation) + packing + plain-JAX reference
# ---------------------------------------------------------------------------
def init_params(key):
    ks = jax.random.split(key, 16)

    def u(k, shape, fan):
        bound = 1.0 / jnp.sqrt(float(fan))
        return jax.random.uniform(k, shape, jnp.float32, -bound, bound)

    return dict(
        # r_up = RNNCell(2, 4)
        w_ih_up=u(ks[0], (4, 2), 4), w_hh_up=u(ks[1], (4, 4), 4),
        b_ih_up=u(ks[2], (4,), 4), b_hh_up=u(ks[3], (4,), 4),
        # fc_obs_1 = Linear(8, 4)
        w1=u(ks[4], (4, 8), 8), b1=u(ks[5], (4,), 8),
        # fc_obs_2 = Linear(4, 4)
        w2=u(ks[6], (4, 4), 4), b2=u(ks[7], (4,), 4),
        # r_down = RNNCell(4, 4)
        w_ih_dn=u(ks[8], (4, 4), 4), w_hh_dn=u(ks[9], (4, 4), 4),
        b_ih_dn=u(ks[10], (4,), 4), b_hh_dn=u(ks[11], (4,), 4),
        # fc_out = Linear(5, 1)
        w_out=u(ks[12], (1, 5), 5), b_out=u(ks[13], (1,), 5),
    )


def pack_params(p):
    wp = jnp.zeros((8, 128), jnp.float32)
    wp = wp.at[0:4, 0:2].set(p["w_ih_up"])
    wp = wp.at[0:4, 2:6].set(p["w_hh_up"])
    wp = wp.at[0:4, 6].set(p["b_ih_up"] + p["b_hh_up"])
    wp = wp.at[0:4, 8:16].set(p["w1"])
    wp = wp.at[0:4, 16].set(p["b1"])
    wp = wp.at[0:4, 17:21].set(p["w2"])
    wp = wp.at[0:4, 21].set(p["b2"])
    wp = wp.at[0:4, 22:26].set(p["w_ih_dn"])
    wp = wp.at[0:4, 26:30].set(p["w_hh_dn"])
    wp = wp.at[0:4, 30].set(p["b_ih_dn"] + p["b_hh_dn"])
    wp = wp.at[0:4, 31].set(p["w_out"][0, 0:4])
    wp = wp.at[0, 32].set(p["w_out"][0, 4])
    wp = wp.at[0, 33].set(p["b_out"][0])
    return wp


def rec_policy_reference(x, p):
    """Plain-JAX replica of the PyTorch forward (f32) for verification."""
    obs, j, jd = x[:, :4], x[:, 4:11], x[:, 11:18]
    B = x.shape[0]
    h = jnp.zeros((B, 4), jnp.float32)
    h_up = [None] * 7
    for i in reversed(range(7)):
        inp = jnp.stack([j[:, i], jd[:, i]], axis=1)
        h = jnp.tanh(inp @ p["w_ih_up"].T + p["b_ih_up"] + h @ p["w_hh_up"].T + p["b_hh_up"])
        h_up[i] = h
    h = jnp.tanh(jnp.concatenate([obs, h], axis=1) @ p["w1"].T + p["b1"])
    h = jnp.tanh(h @ p["w2"].T + p["b2"])
    acts = []
    for i in range(7):
        acts.append(jnp.concatenate([h, j[:, i:i + 1]], axis=1) @ p["w_out"].T + p["b_out"])
        h = jnp.tanh(h_up[i] @ p["w_ih_dn"].T + p["b_ih_dn"] + h @ p["w_hh_dn"].T + p["b_hh_dn"])
    return jnp.concatenate(acts, axis=1)


if __name__ == "__main__":
    key = jax.random.PRNGKey(0)
    k_x, k_x2, k_p = jax.random.split(key, 3)

    params = init_params(k_p)
    wpack = pack_params(params)

    # small smoke test (B=2)
    B = 2
    x = jax.random.normal(k_x, (B, 18), dtype=jnp.float32)   # [obs(4) | j(7) | jd(7)]
    out = jax.block_until_ready(rec_policy_forward(x, wpack))
    ref = rec_policy_reference(x, params)
    assert out.shape == (B, 7)
    assert jnp.allclose(out, ref, atol=1e-4, rtol=1e-4), (out, ref)

    # multi-tile grid + padding path (B not a multiple of the tile)
    B2 = 260
    x2 = jax.random.normal(k_x2, (B2, 18), dtype=jnp.float32)
    out2 = jax.block_until_ready(rec_policy_forward(x2, wpack, tile_b=128))
    ref2 = rec_policy_reference(x2, params)
    assert out2.shape == (B2, 7)
    assert jnp.allclose(out2, ref2, atol=1e-4, rtol=1e-4)

    print("KERNEL_OK")
</pallas_src>

<mosaic_0001>
module attributes {stable_mosaic.version = 11 : i64} {
  func.func @rec_policy_kernel(%arg0: i32, %arg1: memref<8x128xf32, #tpu.memory_space<vmem>>, %arg2: memref<18x128xf32, #tpu.memory_space<vmem>>, %arg3: memref<7x128xf32, #tpu.memory_space<vmem>>) attributes {dimension_semantics = [#tpu.dimension_semantics<parallel>], iteration_bounds = array<i64: 1>, scalar_prefetch = 0 : i64, scratch_operands = 0 : i64, tpu.core_type = #tpu.core_type<tc>, window_params = [{pipeline_mode = #tpu.pipeline_mode<synchronous>, transform_indices = @transform_0, window_bounds = array<i64: 8, 128>}, {transform_indices = @transform_1, window_bounds = array<i64: 18, 128>}, {transform_indices = @transform_2, window_bounds = array<i64: 7, 128>}]} {
    %c0 = arith.constant 0 : index
    %c0_0 = arith.constant 0 : index
    %0 = vector.load %arg1[%c0, %c0_0] : memref<8x128xf32, #tpu.memory_space<vmem>>, vector<8x128xf32>
    %c0_1 = arith.constant 0 : index
    %c0_2 = arith.constant 0 : index
    %1 = vector.load %arg2[%c0_1, %c0_2] : memref<18x128xf32, #tpu.memory_space<vmem>>, vector<18x128xf32>
    %2 = vector.extract_strided_slice %1 {offsets = [0, 0], sizes = [4, 128], strides = [1, 1]} : vector<18x128xf32> to vector<4x128xf32>
    %3 = vector.extract_strided_slice %0 {offsets = [0, 0], sizes = [4, 2], strides = [1, 1]} : vector<8x128xf32> to vector<4x2xf32>
    %4 = vector.extract_strided_slice %0 {offsets = [0, 2], sizes = [4, 4], strides = [1, 1]} : vector<8x128xf32> to vector<4x4xf32>
    %5 = vector.extract_strided_slice %0 {offsets = [0, 6], sizes = [4, 1], strides = [1, 1]} : vector<8x128xf32> to vector<4x1xf32>
    %6 = vector.extract_strided_slice %0 {offsets = [0, 8], sizes = [4, 4], strides = [1, 1]} : vector<8x128xf32> to vector<4x4xf32>
    %7 = vector.extract_strided_slice %0 {offsets = [0, 12], sizes = [4, 4], strides = [1, 1]} : vector<8x128xf32> to vector<4x4xf32>
    %8 = vector.extract_strided_slice %0 {offsets = [0, 16], sizes = [4, 1], strides = [1, 1]} : vector<8x128xf32> to vector<4x1xf32>
    %9 = vector.extract_strided_slice %0 {offsets = [0, 17], sizes = [4, 4], strides = [1, 1]} : vector<8x128xf32> to vector<4x4xf32>
    %10 = vector.extract_strided_slice %0 {offsets = [0, 21], sizes = [4, 1], strides = [1, 1]} : vector<8x128xf32> to vector<4x1xf32>
    %11 = vector.extract_strided_slice %0 {offsets = [0, 22], sizes = [4, 4], strides = [1, 1]} : vector<8x128xf32> to vector<4x4xf32>
    %12 = vector.extract_strided_slice %0 {offsets = [0, 26], sizes = [4, 4], strides = [1, 1]} : vector<8x128xf32> to vector<4x4xf32>
    %13 = vector.extract_strided_slice %0 {offsets = [0, 30], sizes = [4, 1], strides = [1, 1]} : vector<8x128xf32> to vector<4x1xf32>
    %14 = vector.extract_strided_slice %0 {offsets = [0, 31], sizes = [4, 1], strides = [1, 1]} : vector<8x128xf32> to vector<4x1xf32>
    %15 = vector.extract_strided_slice %0 {offsets = [0, 32], sizes = [1, 1], strides = [1, 1]} : vector<8x128xf32> to vector<1x1xf32>
    %16 = vector.extract_strided_slice %0 {offsets = [0, 33], sizes = [1, 1], strides = [1, 1]} : vector<8x128xf32> to vector<1x1xf32>
    %17 = vector.extract_strided_slice %3 {offsets = [0, 0], sizes = [4, 1], strides = [1, 1]} : vector<4x2xf32> to vector<4x1xf32>
    %18 = vector.extract_strided_slice %1 {offsets = [4, 0], sizes = [1, 128], strides = [1, 1]} : vector<18x128xf32> to vector<1x128xf32>
    %19 = vector.broadcast %17 : vector<4x1xf32> to vector<4x128xf32>
    %20 = vector.broadcast %18 : vector<1x128xf32> to vector<4x128xf32>
    %21 = arith.mulf %19, %20 : vector<4x128xf32>
    %22 = vector.extract_strided_slice %3 {offsets = [0, 1], sizes = [4, 1], strides = [1, 1]} : vector<4x2xf32> to vector<4x1xf32>
    %23 = vector.extract_strided_slice %1 {offsets = [11, 0], sizes = [1, 128], strides = [1, 1]} : vector<18x128xf32> to vector<1x128xf32>
    %24 = vector.broadcast %22 : vector<4x1xf32> to vector<4x128xf32>
    %25 = vector.broadcast %23 : vector<1x128xf32> to vector<4x128xf32>
    %26 = arith.mulf %24, %25 : vector<4x128xf32>
    %27 = arith.addf %21, %26 : vector<4x128xf32>
    %28 = vector.broadcast %5 : vector<4x1xf32> to vector<4x128xf32>
    %29 = arith.addf %27, %28 : vector<4x128xf32>
    %30 = vector.extract_strided_slice %3 {offsets = [0, 0], sizes = [4, 1], strides = [1, 1]} : vector<4x2xf32> to vector<4x1xf32>
    %31 = vector.extract_strided_slice %1 {offsets = [5, 0], sizes = [1, 128], strides = [1, 1]} : vector<18x128xf32> to vector<1x128xf32>
    %32 = vector.broadcast %30 : vector<4x1xf32> to vector<4x128xf32>
    %33 = vector.broadcast %31 : vector<1x128xf32> to vector<4x128xf32>
    %34 = arith.mulf %32, %33 : vector<4x128xf32>
    %35 = vector.extract_strided_slice %3 {offsets = [0, 1], sizes = [4, 1], strides = [1, 1]} : vector<4x2xf32> to vector<4x1xf32>
    %36 = vector.extract_strided_slice %1 {offsets = [12, 0], sizes = [1, 128], strides = [1, 1]} : vector<18x128xf32> to vector<1x128xf32>
    %37 = vector.broadcast %35 : vector<4x1xf32> to vector<4x128xf32>
    %38 = vector.broadcast %36 : vector<1x128xf32> to vector<4x128xf32>
    %39 = arith.mulf %37, %38 : vector<4x128xf32>
    %40 = arith.addf %34, %39 : vector<4x128xf32>
    %41 = vector.broadcast %5 : vector<4x1xf32> to vector<4x128xf32>
    %42 = arith.addf %40, %41 : vector<4x128xf32>
    %43 = vector.extract_strided_slice %3 {offsets = [0, 0], sizes = [4, 1], strides = [1, 1]} : vector<4x2xf32> to vector<4x1xf32>
    %44 = vector.extract_strided_slice %1 {offsets = [6, 0], sizes = [1, 128], strides = [1, 1]} : vector<18x128xf32> to vector<1x128xf32>
    %45 = vector.broadcast %43 : vector<4x1xf32> to vector<4x128xf32>
    %46 = vector.broadcast %44 : vector<1x128xf32> to vector<4x128xf32>
    %47 = arith.mulf %45, %46 : vector<4x128xf32>
    %48 = vector.extract_strided_slice %3 {offsets = [0, 1], sizes = [4, 1], strides = [1, 1]} : vector<4x2xf32> to vector<4x1xf32>
    %49 = vector.extract_strided_slice %1 {offsets = [13, 0], sizes = [1, 128], strides = [1, 1]} : vector<18x128xf32> to vector<1x128xf32>
    %50 = vector.broadcast %48 : vector<4x1xf32> to vector<4x128xf32>
    %51 = vector.broadcast %49 : vector<1x128xf32> to vector<4x128xf32>
    %52 = arith.mulf %50, %51 : vector<4x128xf32>
    %53 = arith.addf %47, %52 : vector<4x128xf32>
    %54 = vector.broadcast %5 : vector<4x1xf32> to vector<4x128xf32>
    %55 = arith.addf %53, %54 : vector<4x128xf32>
    %56 = vector.extract_strided_slice %3 {offsets = [0, 0], sizes = [4, 1], strides = [1, 1]} : vector<4x2xf32> to vector<4x1xf32>
    %57 = vector.extract_strided_slice %1 {offsets = [7, 0], sizes = [1, 128], strides = [1, 1]} : vector<18x128xf32> to vector<1x128xf32>
    %58 = vector.broadcast %56 : vector<4x1xf32> to vector<4x128xf32>
    %59 = vector.broadcast %57 : vector<1x128xf32> to vector<4x128xf32>
    %60 = arith.mulf %58, %59 : vector<4x128xf32>
    %61 = vector.extract_strided_slice %3 {offsets = [0, 1], sizes = [4, 1], strides = [1, 1]} : vector<4x2xf32> to vector<4x1xf32>
    %62 = vector.extract_strided_slice %1 {offsets = [14, 0], sizes = [1, 128], strides = [1, 1]} : vector<18x128xf32> to vector<1x128xf32>
    %63 = vector.broadcast %61 : vector<4x1xf32> to vector<4x128xf32>
    %64 = vector.broadcast %62 : vector<1x128xf32> to vector<4x128xf32>
    %65 = arith.mulf %63, %64 : vector<4x128xf32>
    %66 = arith.addf %60, %65 : vector<4x128xf32>
    %67 = vector.broadcast %5 : vector<4x1xf32> to vector<4x128xf32>
    %68 = arith.addf %66, %67 : vector<4x128xf32>
    %69 = vector.extract_strided_slice %3 {offsets = [0, 0], sizes = [4, 1], strides = [1, 1]} : vector<4x2xf32> to vector<4x1xf32>
    %70 = vector.extract_strided_slice %1 {offsets = [8, 0], sizes = [1, 128], strides = [1, 1]} : vector<18x128xf32> to vector<1x128xf32>
    %71 = vector.broadcast %69 : vector<4x1xf32> to vector<4x128xf32>
    %72 = vector.broadcast %70 : vector<1x128xf32> to vector<4x128xf32>
    %73 = arith.mulf %71, %72 : vector<4x128xf32>
    %74 = vector.extract_strided_slice %3 {offsets = [0, 1], sizes = [4, 1], strides = [1, 1]} : vector<4x2xf32> to vector<4x1xf32>
    %75 = vector.extract_strided_slice %1 {offsets = [15, 0], sizes = [1, 128], strides = [1, 1]} : vector<18x128xf32> to vector<1x128xf32>
    %76 = vector.broadcast %74 : vector<4x1xf32> to vector<4x128xf32>
    %77 = vector.broadcast %75 : vector<1x128xf32> to vector<4x128xf32>
    %78 = arith.mulf %76, %77 : vector<4x128xf32>
    %79 = arith.addf %73, %78 : vector<4x128xf32>
    %80 = vector.broadcast %5 : vector<4x1xf32> to vector<4x128xf32>
    %81 = arith.addf %79, %80 : vector<4x128xf32>
    %82 = vector.extract_strided_slice %3 {offsets = [0, 0], sizes = [4, 1], strides = [1, 1]} : vector<4x2xf32> to vector<4x1xf32>
    %83 = vector.extract_strided_slice %1 {offsets = [9, 0], sizes = [1, 128], strides = [1, 1]} : vector<18x128xf32> to vector<1x128xf32>
    %84 = vector.broadcast %82 : vector<4x1xf32> to vector<4x128xf32>
    %85 = vector.broadcast %83 : vector<1x128xf32> to vector<4x128xf32>
    %86 = arith.mulf %84, %85 : vector<4x128xf32>
    %87 = vector.extract_strided_slice %3 {offsets = [0, 1], sizes = [4, 1], strides = [1, 1]} : vector<4x2xf32> to vector<4x1xf32>
    %88 = vector.extract_strided_slice %1 {offsets = [16, 0], sizes = [1, 128], strides = [1, 1]} : vector<18x128xf32> to vector<1x128xf32>
    %89 = vector.broadcast %87 : vector<4x1xf32> to vector<4x128xf32>
    %90 = vector.broadcast %88 : vector<1x128xf32> to vector<4x128xf32>
    %91 = arith.mulf %89, %90 : vector<4x128xf32>
    %92 = arith.addf %86, %91 : vector<4x128xf32>
    %93 = vector.broadcast %5 : vector<4x1xf32> to vector<4x128xf32>
    %94 = arith.addf %92, %93 : vector<4x128xf32>
    %95 = vector.extract_strided_slice %3 {offsets = [0, 0], sizes = [4, 1], strides = [1, 1]} : vector<4x2xf32> to vector<4x1xf32>
    %96 = vector.extract_strided_slice %1 {offsets = [10, 0], sizes = [1, 128], strides = [1, 1]} : vector<18x128xf32> to vector<1x128xf32>
    %97 = vector.broadcast %95 : vector<4x1xf32> to vector<4x128xf32>
    %98 = vector.broadcast %96 : vector<1x128xf32> to vector<4x128xf32>
    %99 = arith.mulf %97, %98 : vector<4x128xf32>
    %100 = vector.extract_strided_slice %3 {offsets = [0, 1], sizes = [4, 1], strides = [1, 1]} : vector<4x2xf32> to vector<4x1xf32>
    %101 = vector.extract_strided_slice %1 {offsets = [17, 0], sizes = [1, 128], strides = [1, 1]} : vector<18x128xf32> to vector<1x128xf32>
    %102 = vector.broadcast %100 : vector<4x1xf32> to vector<4x128xf32>
    %103 = vector.broadcast %101 : vector<1x128xf32> to vector<4x128xf32>
    %104 = arith.mulf %102, %103 : vector<4x128xf32>
    %105 = arith.addf %99, %104 : vector<4x128xf32>
    %106 = vector.broadcast %5 : vector<4x1xf32> to vector<4x128xf32>
    %107 = arith.addf %105, %106 : vector<4x128xf32>
    %108 = vector.extract_strided_slice %1 {offsets = [4, 0], sizes = [1, 128], strides = [1, 1]} : vector<18x128xf32> to vector<1x128xf32>
    %109 = vector.broadcast %15 : vector<1x1xf32> to vector<1x128xf32>
    %110 = arith.mulf %109, %108 : vector<1x128xf32>
    %111 = vector.broadcast %16 : vector<1x1xf32> to vector<1x128xf32>
    %112 = arith.addf %110, %111 : vector<1x128xf32>
    %113 = vector.extract_strided_slice %1 {offsets = [5, 0], sizes = [1, 128], strides = [1, 1]} : vector<18x128xf32> to vector<1x128xf32>
    %114 = vector.broadcast %15 : vector<1x1xf32> to vector<1x128xf32>
    %115 = arith.mulf %114, %113 : vector<1x128xf32>
    %116 = vector.broadcast %16 : vector<1x1xf32> to vector<1x128xf32>
    %117 = arith.addf %115, %116 : vector<1x128xf32>
    %118 = vector.extract_strided_slice %1 {offsets = [6, 0], sizes = [1, 128], strides = [1, 1]} : vector<18x128xf32> to vector<1x128xf32>
    %119 = vector.broadcast %15 : vector<1x1xf32> to vector<1x128xf32>
    %120 = arith.mulf %119, %118 : vector<1x128xf32>
    %121 = vector.broadcast %16 : vector<1x1xf32> to vector<1x128xf32>
    %122 = arith.addf %120, %121 : vector<1x128xf32>
    %123 = vector.extract_strided_slice %1 {offsets = [7, 0], sizes = [1, 128], strides = [1, 1]} : vector<18x128xf32> to vector<1x128xf32>
    %124 = vector.broadcast %15 : vector<1x1xf32> to vector<1x128xf32>
    %125 = arith.mulf %124, %123 : vector<1x128xf32>
    %126 = vector.broadcast %16 : vector<1x1xf32> to vector<1x128xf32>
    %127 = arith.addf %125, %126 : vector<1x128xf32>
    %128 = vector.extract_strided_slice %1 {offsets = [8, 0], sizes = [1, 128], strides = [1, 1]} : vector<18x128xf32> to vector<1x128xf32>
    %129 = vector.broadcast %15 : vector<1x1xf32> to vector<1x128xf32>
    %130 = arith.mulf %129, %128 : vector<1x128xf32>
    %131 = vector.broadcast %16 : vector<1x1xf32> to vector<1x128xf32>
    %132 = arith.addf %130, %131 : vector<1x128xf32>
    %133 = vector.extract_strided_slice %1 {offsets = [9, 0], sizes = [1, 128], strides = [1, 1]} : vector<18x128xf32> to vector<1x128xf32>
    %134 = vector.broadcast %15 : vector<1x1xf32> to vector<1x128xf32>
    %135 = arith.mulf %134, %133 : vector<1x128xf32>
    %136 = vector.broadcast %16 : vector<1x1xf32> to vector<1x128xf32>
    %137 = arith.addf %135, %136 : vector<1x128xf32>
    %138 = vector.extract_strided_slice %1 {offsets = [10, 0], sizes = [1, 128], strides = [1, 1]} : vector<18x128xf32> to vector<1x128xf32>
    %139 = vector.broadcast %15 : vector<1x1xf32> to vector<1x128xf32>
    %140 = arith.mulf %139, %138 : vector<1x128xf32>
    %141 = vector.broadcast %16 : vector<1x1xf32> to vector<1x128xf32>
    %142 = arith.addf %140, %141 : vector<1x128xf32>
    %143 = math.tanh %107 : vector<4x128xf32>
    %144 = vector.extract_strided_slice %4 {offsets = [0, 0], sizes = [4, 1], strides = [1, 1]} : vector<4x4xf32> to vector<4x1xf32>
    %145 = vector.extract_strided_slice %143 {offsets = [0, 0], sizes = [1, 128], strides = [1, 1]} : vector<4x128xf32> to vector<1x128xf32>
    %146 = vector.broadcast %144 : vector<4x1xf32> to vector<4x128xf32>
    %147 = vector.broadcast %145 : vector<1x128xf32> to vector<4x128xf32>
    %148 = arith.mulf %146, %147 : vector<4x128xf32>
    %149 = vector.extract_strided_slice %4 {offsets = [0, 1], sizes = [4, 1], strides = [1, 1]} : vector<4x4xf32> to vector<4x1xf32>
    %150 = vector.extract_strided_slice %143 {offsets = [1, 0], sizes = [1, 128], strides = [1, 1]} : vector<4x128xf32> to vector<1x128xf32>
    %151 = vector.broadcast %149 : vector<4x1xf32> to vector<4x128xf32>
    %152 = vector.broadcast %150 : vector<1x128xf32> to vector<4x128xf32>
    %153 = arith.mulf %151, %152 : vector<4x128xf32>
    %154 = arith.addf %148, %153 : vector<4x128xf32>
    %155 = vector.extract_strided_slice %4 {offsets = [0, 2], sizes = [4, 1], strides = [1, 1]} : vector<4x4xf32> to vector<4x1xf32>
    %156 = vector.extract_strided_slice %143 {offsets = [2, 0], sizes = [1, 128], strides = [1, 1]} : vector<4x128xf32> to vector<1x128xf32>
    %157 = vector.broadcast %155 : vector<4x1xf32> to vector<4x128xf32>
    %158 = vector.broadcast %156 : vector<1x128xf32> to vector<4x128xf32>
    %159 = arith.mulf %157, %158 : vector<4x128xf32>
    %160 = arith.addf %154, %159 : vector<4x128xf32>
    %161 = vector.extract_strided_slice %4 {offsets = [0, 3], sizes = [4, 1], strides = [1, 1]} : vector<4x4xf32> to vector<4x1xf32>
    %162 = vector.extract_strided_slice %143 {offsets = [3, 0], sizes = [1, 128], strides = [1, 1]} : vector<4x128xf32> to vector<1x128xf32>
    %163 = vector.broadcast %161 : vector<4x1xf32> to vector<4x128xf32>
    %164 = vector.broadcast %162 : vector<1x128xf32> to vector<4x128xf32>
    %165 = arith.mulf %163, %164 : vector<4x128xf32>
    %166 = arith.addf %160, %165 : vector<4x128xf32>
    %167 = arith.addf %166, %94 : vector<4x128xf32>
    %168 = math.tanh %167 : vector<4x128xf32>
    %169 = vector.extract_strided_slice %4 {offsets = [0, 0], sizes = [4, 1], strides = [1, 1]} : vector<4x4xf32> to vector<4x1xf32>
    %170 = vector.extract_strided_slice %168 {offsets = [0, 0], sizes = [1, 128], strides = [1, 1]} : vector<4x128xf32> to vector<1x128xf32>
    %171 = vector.broadcast %169 : vector<4x1xf32> to vector<4x128xf32>
    %172 = vector.broadcast %170 : vector<1x128xf32> to vector<4x128xf32>
    %173 = arith.mulf %171, %172 : vector<4x128xf32>
    %174 = vector.extract_strided_slice %4 {offsets = [0, 1], sizes = [4, 1], strides = [1, 1]} : vector<4x4xf32> to vector<4x1xf32>
    %175 = vector.extract_strided_slice %168 {offsets = [1, 0], sizes = [1, 128], strides = [1, 1]} : vector<4x128xf32> to vector<1x128xf32>
    %176 = vector.broadcast %174 : vector<4x1xf32> to vector<4x128xf32>
    %177 = vector.broadcast %175 : vector<1x128xf32> to vector<4x128xf32>
    %178 = arith.mulf %176, %177 : vector<4x128xf32>
    %179 = arith.addf %173, %178 : vector<4x128xf32>
    %180 = vector.extract_strided_slice %4 {offsets = [0, 2], sizes = [4, 1], strides = [1, 1]} : vector<4x4xf32> to vector<4x1xf32>
    %181 = vector.extract_strided_slice %168 {offsets = [2, 0], sizes = [1, 128], strides = [1, 1]} : vector<4x128xf32> to vector<1x128xf32>
    %182 = vector.broadcast %180 : vector<4x1xf32> to vector<4x128xf32>
    %183 = vector.broadcast %181 : vector<1x128xf32> to vector<4x128xf32>
    %184 = arith.mulf %182, %183 : vector<4x128xf32>
    %185 = arith.addf %179, %184 : vector<4x128xf32>
    %186 = vector.extract_strided_slice %4 {offsets = [0, 3], sizes = [4, 1], strides = [1, 1]} : vector<4x4xf32> to vector<4x1xf32>
    %187 = vector.extract_strided_slice %168 {offsets = [3, 0], sizes = [1, 128], strides = [1, 1]} : vector<4x128xf32> to vector<1x128xf32>
    %188 = vector.broadcast %186 : vector<4x1xf32> to vector<4x128xf32>
    %189 = vector.broadcast %187 : vector<1x128xf32> to vector<4x128xf32>
    %190 = arith.mulf %188, %189 : vector<4x128xf32>
    %191 = arith.addf %185, %190 : vector<4x128xf32>
    %192 = arith.addf %191, %81 : vector<4x128xf32>
    %193 = math.tanh %192 : vector<4x128xf32>
    %194 = vector.extract_strided_slice %4 {offsets = [0, 0], sizes = [4, 1], strides = [1, 1]} : vector<4x4xf32> to vector<4x1xf32>
    %195 = vector.extract_strided_slice %193 {offsets = [0, 0], sizes = [1, 128], strides = [1, 1]} : vector<4x128xf32> to vector<1x128xf32>
    %196 = vector.broadcast %194 : vector<4x1xf32> to vector<4x128xf32>
    %197 = vector.broadcast %195 : vector<1x128xf32> to vector<4x128xf32>
    %198 = arith.mulf %196, %197 : vector<4x128xf32>
    %199 = vector.extract_strided_slice %4 {offsets = [0, 1], sizes = [4, 1], strides = [1, 1]} : vector<4x4xf32> to vector<4x1xf32>
    %200 = vector.extract_strided_slice %193 {offsets = [1, 0], sizes = [1, 128], strides = [1, 1]} : vector<4x128xf32> to vector<1x128xf32>
    %201 = vector.broadcast %199 : vector<4x1xf32> to vector<4x128xf32>
    %202 = vector.broadcast %200 : vector<1x128xf32> to vector<4x128xf32>
    %203 = arith.mulf %201, %202 : vector<4x128xf32>
    %204 = arith.addf %198, %203 : vector<4x128xf32>
    %205 = vector.extract_strided_slice %4 {offsets = [0, 2], sizes = [4, 1], strides = [1, 1]} : vector<4x4xf32> to vector<4x1xf32>
    %206 = vector.extract_strided_slice %193 {offsets = [2, 0], sizes = [1, 128], strides = [1, 1]} : vector<4x128xf32> to vector<1x128xf32>
    %207 = vector.broadcast %205 : vector<4x1xf32> to vector<4x128xf32>
    %208 = vector.broadcast %206 : vector<1x128xf32> to vector<4x128xf32>
    %209 = arith.mulf %207, %208 : vector<4x128xf32>
    %210 = arith.addf %204, %209 : vector<4x128xf32>
    %211 = vector.extract_strided_slice %4 {offsets = [0, 3], sizes = [4, 1], strides = [1, 1]} : vector<4x4xf32> to vector<4x1xf32>
    %212 = vector.extract_strided_slice %193 {offsets = [3, 0], sizes = [1, 128], strides = [1, 1]} : vector<4x128xf32> to vector<1x128xf32>
    %213 = vector.broadcast %211 : vector<4x1xf32> to vector<4x128xf32>
    %214 = vector.broadcast %212 : vector<1x128xf32> to vector<4x128xf32>
    %215 = arith.mulf %213, %214 : vector<4x128xf32>
    %216 = arith.addf %210, %215 : vector<4x128xf32>
    %217 = arith.addf %216, %68 : vector<4x128xf32>
    %218 = math.tanh %217 : vector<4x128xf32>
    %219 = vector.extract_strided_slice %4 {offsets = [0, 0], sizes = [4, 1], strides = [1, 1]} : vector<4x4xf32> to vector<4x1xf32>
    %220 = vector.extract_strided_slice %218 {offsets = [0, 0], sizes = [1, 128], strides = [1, 1]} : vector<4x128xf32> to vector<1x128xf32>
    %221 = vector.broadcast %219 : vector<4x1xf32> to vector<4x128xf32>
    %222 = vector.broadcast %220 : vector<1x128xf32> to vector<4x128xf32>
    %223 = arith.mulf %221, %222 : vector<4x128xf32>
    %224 = vector.extract_strided_slice %4 {offsets = [0, 1], sizes = [4, 1], strides = [1, 1]} : vector<4x4xf32> to vector<4x1xf32>
    %225 = vector.extract_strided_slice %218 {offsets = [1, 0], sizes = [1, 128], strides = [1, 1]} : vector<4x128xf32> to vector<1x128xf32>
    %226 = vector.broadcast %224 : vector<4x1xf32> to vector<4x128xf32>
    %227 = vector.broadcast %225 : vector<1x128xf32> to vector<4x128xf32>
    %228 = arith.mulf %226, %227 : vector<4x128xf32>
    %229 = arith.addf %223, %228 : vector<4x128xf32>
    %230 = vector.extract_strided_slice %4 {offsets = [0, 2], sizes = [4, 1], strides = [1, 1]} : vector<4x4xf32> to vector<4x1xf32>
    %231 = vector.extract_strided_slice %218 {offsets = [2, 0], sizes = [1, 128], strides = [1, 1]} : vector<4x128xf32> to vector<1x128xf32>
    %232 = vector.broadcast %230 : vector<4x1xf32> to vector<4x128xf32>
    %233 = vector.broadcast %231 : vector<1x128xf32> to vector<4x128xf32>
    %234 = arith.mulf %232, %233 : vector<4x128xf32>
    %235 = arith.addf %229, %234 : vector<4x128xf32>
    %236 = vector.extract_strided_slice %4 {offsets = [0, 3], sizes = [4, 1], strides = [1, 1]} : vector<4x4xf32> to vector<4x1xf32>
    %237 = vector.extract_strided_slice %218 {offsets = [3, 0], sizes = [1, 128], strides = [1, 1]} : vector<4x128xf32> to vector<1x128xf32>
    %238 = vector.broadcast %236 : vector<4x1xf32> to vector<4x128xf32>
    %239 = vector.broadcast %237 : vector<1x128xf32> to vector<4x128xf32>
    %240 = arith.mulf %238, %239 : vector<4x128xf32>
    %241 = arith.addf %235, %240 : vector<4x128xf32>
    %242 = arith.addf %241, %55 : vector<4x128xf32>
    %243 = math.tanh %242 : vector<4x128xf32>
    %244 = vector.extract_strided_slice %4 {offsets = [0, 0], sizes = [4, 1], strides = [1, 1]} : vector<4x4xf32> to vector<4x1xf32>
    %245 = vector.extract_strided_slice %243 {offsets = [0, 0], sizes = [1, 128], strides = [1, 1]} : vector<4x128xf32> to vector<1x128xf32>
    %246 = vector.broadcast %244 : vector<4x1xf32> to vector<4x128xf32>
    %247 = vector.broadcast %245 : vector<1x128xf32> to vector<4x128xf32>
    %248 = arith.mulf %246, %247 : vector<4x128xf32>
    %249 = vector.extract_strided_slice %4 {offsets = [0, 1], sizes = [4, 1], strides = [1, 1]} : vector<4x4xf32> to vector<4x1xf32>
    %250 = vector.extract_strided_slice %243 {offsets = [1, 0], sizes = [1, 128], strides = [1, 1]} : vector<4x128xf32> to vector<1x128xf32>
    %251 = vector.broadcast %249 : vector<4x1xf32> to vector<4x128xf32>
    %252 = vector.broadcast %250 : vector<1x128xf32> to vector<4x128xf32>
    %253 = arith.mulf %251, %252 : vector<4x128xf32>
    %254 = arith.addf %248, %253 : vector<4x128xf32>
    %255 = vector.extract_strided_slice %4 {offsets = [0, 2], sizes = [4, 1], strides = [1, 1]} : vector<4x4xf32> to vector<4x1xf32>
    %256 = vector.extract_strided_slice %243 {offsets = [2, 0], sizes = [1, 128], strides = [1, 1]} : vector<4x128xf32> to vector<1x128xf32>
    %257 = vector.broadcast %255 : vector<4x1xf32> to vector<4x128xf32>
    %258 = vector.broadcast %256 : vector<1x128xf32> to vector<4x128xf32>
    %259 = arith.mulf %257, %258 : vector<4x128xf32>
    %260 = arith.addf %254, %259 : vector<4x128xf32>
    %261 = vector.extract_strided_slice %4 {offsets = [0, 3], sizes = [4, 1], strides = [1, 1]} : vector<4x4xf32> to vector<4x1xf32>
    %262 = vector.extract_strided_slice %243 {offsets = [3, 0], sizes = [1, 128], strides = [1, 1]} : vector<4x128xf32> to vector<1x128xf32>
    %263 = vector.broadcast %261 : vector<4x1xf32> to vector<4x128xf32>
    %264 = vector.broadcast %262 : vector<1x128xf32> to vector<4x128xf32>
    %265 = arith.mulf %263, %264 : vector<4x128xf32>
    %266 = arith.addf %260, %265 : vector<4x128xf32>
    %267 = arith.addf %266, %42 : vector<4x128xf32>
    %268 = math.tanh %267 : vector<4x128xf32>
    %269 = vector.extract_strided_slice %4 {offsets = [0, 0], sizes = [4, 1], strides = [1, 1]} : vector<4x4xf32> to vector<4x1xf32>
    %270 = vector.extract_strided_slice %268 {offsets = [0, 0], sizes = [1, 128], strides = [1, 1]} : vector<4x128xf32> to vector<1x128xf32>
    %271 = vector.broadcast %269 : vector<4x1xf32> to vector<4x128xf32>
    %272 = vector.broadcast %270 : vector<1x128xf32> to vector<4x128xf32>
    %273 = arith.mulf %271, %272 : vector<4x128xf32>
    %274 = vector.extract_strided_slice %4 {offsets = [0, 1], sizes = [4, 1], strides = [1, 1]} : vector<4x4xf32> to vector<4x1xf32>
    %275 = vector.extract_strided_slice %268 {offsets = [1, 0], sizes = [1, 128], strides = [1, 1]} : vector<4x128xf32> to vector<1x128xf32>
    %276 = vector.broadcast %274 : vector<4x1xf32> to vector<4x128xf32>
    %277 = vector.broadcast %275 : vector<1x128xf32> to vector<4x128xf32>
    %278 = arith.mulf %276, %277 : vector<4x128xf32>
    %279 = arith.addf %273, %278 : vector<4x128xf32>
    %280 = vector.extract_strided_slice %4 {offsets = [0, 2], sizes = [4, 1], strides = [1, 1]} : vector<4x4xf32> to vector<4x1xf32>
    %281 = vector.extract_strided_slice %268 {offsets = [2, 0], sizes = [1, 128], strides = [1, 1]} : vector<4x128xf32> to vector<1x128xf32>
    %282 = vector.broadcast %280 : vector<4x1xf32> to vector<4x128xf32>
    %283 = vector.broadcast %281 : vector<1x128xf32> to vector<4x128xf32>
    %284 = arith.mulf %282, %283 : vector<4x128xf32>
    %285 = arith.addf %279, %284 : vector<4x128xf32>
    %286 = vector.extract_strided_slice %4 {offsets = [0, 3], sizes = [4, 1], strides = [1, 1]} : vector<4x4xf32> to vector<4x1xf32>
    %287 = vector.extract_strided_slice %268 {offsets = [3, 0], sizes = [1, 128], strides = [1, 1]} : vector<4x128xf32> to vector<1x128xf32>
    %288 = vector.broadcast %286 : vector<4x1xf32> to vector<4x128xf32>
    %289 = vector.broadcast %287 : vector<1x128xf32> to vector<4x128xf32>
    %290 = arith.mulf %288, %289 : vector<4x128xf32>
    %291 = arith.addf %285, %290 : vector<4x128xf32>
    %292 = arith.addf %291, %29 : vector<4x128xf32>
    %293 = math.tanh %292 : vector<4x128xf32>
    %294 = vector.extract_strided_slice %6 {offsets = [0, 0], sizes = [4, 1], strides = [1, 1]} : vector<4x4xf32> to vector<4x1xf32>
    %295 = vector.extract_strided_slice %2 {offsets = [0, 0], sizes = [1, 128], strides = [1, 1]} : vector<4x128xf32> to vector<1x128xf32>
    %296 = vector.broadcast %294 : vector<4x1xf32> to vector<4x128xf32>
    %297 = vector.broadcast %295 : vector<1x128xf32> to vector<4x128xf32>
    %298 = arith.mulf %296, %297 : vector<4x128xf32>
    %299 = vector.extract_strided_slice %6 {offsets = [0, 1], sizes = [4, 1], strides = [1, 1]} : vector<4x4xf32> to vector<4x1xf32>
    %300 = vector.extract_strided_slice %2 {offsets = [1, 0], sizes = [1, 128], strides = [1, 1]} : vector<4x128xf32> to vector<1x128xf32>
    %301 = vector.broadcast %299 : vector<4x1xf32> to vector<4x128xf32>
    %302 = vector.broadcast %300 : vector<1x128xf32> to vector<4x128xf32>
    %303 = arith.mulf %301, %302 : vector<4x128xf32>
    %304 = arith.addf %298, %303 : vector<4x128xf32>
    %305 = vector.extract_strided_slice %6 {offsets = [0, 2], sizes = [4, 1], strides = [1, 1]} : vector<4x4xf32> to vector<4x1xf32>
    %306 = vector.extract_strided_slice %2 {offsets = [2, 0], sizes = [1, 128], strides = [1, 1]} : vector<4x128xf32> to vector<1x128xf32>
    %307 = vector.broadcast %305 : vector<4x1xf32> to vector<4x128xf32>
    %308 = vector.broadcast %306 : vector<1x128xf32> to vector<4x128xf32>
    %309 = arith.mulf %307, %308 : vector<4x128xf32>
    %310 = arith.addf %304, %309 : vector<4x128xf32>
    %311 = vector.extract_strided_slice %6 {offsets = [0, 3], sizes = [4, 1], strides = [1, 1]} : vector<4x4xf32> to vector<4x1xf32>
    %312 = vector.extract_strided_slice %2 {offsets = [3, 0], sizes = [1, 128], strides = [1, 1]} : vector<4x128xf32> to vector<1x128xf32>
    %313 = vector.broadcast %311 : vector<4x1xf32> to vector<4x128xf32>
    %314 = vector.broadcast %312 : vector<1x128xf32> to vector<4x128xf32>
    %315 = arith.mulf %313, %314 : vector<4x128xf32>
    %316 = arith.addf %310, %315 : vector<4x128xf32>
    %317 = vector.extract_strided_slice %7 {offsets = [0, 0], sizes = [4, 1], strides = [1, 1]} : vector<4x4xf32> to vector<4x1xf32>
    %318 = vector.extract_strided_slice %293 {offsets = [0, 0], sizes = [1, 128], strides = [1, 1]} : vector<4x128xf32> to vector<1x128xf32>
    %319 = vector.broadcast %317 : vector<4x1xf32> to vector<4x128xf32>
    %320 = vector.broadcast %318 : vector<1x128xf32> to vector<4x128xf32>
    %321 = arith.mulf %319, %320 : vector<4x128xf32>
    %322 = vector.extract_strided_slice %7 {offsets = [0, 1], sizes = [4, 1], strides = [1, 1]} : vector<4x4xf32> to vector<4x1xf32>
    %323 = vector.extract_strided_slice %293 {offsets = [1, 0], sizes = [1, 128], strides = [1, 1]} : vector<4x128xf32> to vector<1x128xf32>
    %324 = vector.broadcast %322 : vector<4x1xf32> to vector<4x128xf32>
    %325 = vector.broadcast %323 : vector<1x128xf32> to vector<4x128xf32>
    %326 = arith.mulf %324, %325 : vector<4x128xf32>
    %327 = arith.addf %321, %326 : vector<4x128xf32>
    %328 = vector.extract_strided_slice %7 {offsets = [0, 2], sizes = [4, 1], strides = [1, 1]} : vector<4x4xf32> to vector<4x1xf32>
    %329 = vector.extract_strided_slice %293 {offsets = [2, 0], sizes = [1, 128], strides = [1, 1]} : vector<4x128xf32> to vector<1x128xf32>
    %330 = vector.broadcast %328 : vector<4x1xf32> to vector<4x128xf32>
    %331 = vector.broadcast %329 : vector<1x128xf32> to vector<4x128xf32>
    %332 = arith.mulf %330, %331 : vector<4x128xf32>
    %333 = arith.addf %327, %332 : vector<4x128xf32>
    %334 = vector.extract_strided_slice %7 {offsets = [0, 3], sizes = [4, 1], strides = [1, 1]} : vector<4x4xf32> to vector<4x1xf32>
    %335 = vector.extract_strided_slice %293 {offsets = [3, 0], sizes = [1, 128], strides = [1, 1]} : vector<4x128xf32> to vector<1x128xf32>
    %336 = vector.broadcast %334 : vector<4x1xf32> to vector<4x128xf32>
    %337 = vector.broadcast %335 : vector<1x128xf32> to vector<4x128xf32>
    %338 = arith.mulf %336, %337 : vector<4x128xf32>
    %339 = arith.addf %333, %338 : vector<4x128xf32>
    %340 = arith.addf %316, %339 : vector<4x128xf32>
    %341 = vector.broadcast %8 : vector<4x1xf32> to vector<4x128xf32>
    %342 = arith.addf %340, %341 : vector<4x128xf32>
    %343 = math.tanh %342 : vector<4x128xf32>
    %344 = vector.extract_strided_slice %9 {offsets = [0, 0], sizes = [4, 1], strides = [1, 1]} : vector<4x4xf32> to vector<4x1xf32>
    %345 = vector.extract_strided_slice %343 {offsets = [0, 0], sizes = [1, 128], strides = [1, 1]} : vector<4x128xf32> to vector<1x128xf32>
    %346 = vector.broadcast %344 : vector<4x1xf32> to vector<4x128xf32>
    %347 = vector.broadcast %345 : vector<1x128xf32> to vector<4x128xf32>
    %348 = arith.mulf %346, %347 : vector<4x128xf32>
    %349 = vector.extract_strided_slice %9 {offsets = [0, 1], sizes = [4, 1], strides = [1, 1]} : vector<4x4xf32> to vector<4x1xf32>
    %350 = vector.extract_strided_slice %343 {offsets = [1, 0], sizes = [1, 128], strides = [1, 1]} : vector<4x128xf32> to vector<1x128xf32>
    %351 = vector.broadcast %349 : vector<4x1xf32> to vector<4x128xf32>
    %352 = vector.broadcast %350 : vector<1x128xf32> to vector<4x128xf32>
    %353 = arith.mulf %351, %352 : vector<4x128xf32>
    %354 = arith.addf %348, %353 : vector<4x128xf32>
    %355 = vector.extract_strided_slice %9 {offsets = [0, 2], sizes = [4, 1], strides = [1, 1]} : vector<4x4xf32> to vector<4x1xf32>
    %356 = vector.extract_strided_slice %343 {offsets = [2, 0], sizes = [1, 128], strides = [1, 1]} : vector<4x128xf32> to vector<1x128xf32>
    %357 = vector.broadcast %355 : vector<4x1xf32> to vector<4x128xf32>
    %358 = vector.broadcast %356 : vector<1x128xf32> to vector<4x128xf32>
    %359 = arith.mulf %357, %358 : vector<4x128xf32>
    %360 = arith.addf %354, %359 : vector<4x128xf32>
    %361 = vector.extract_strided_slice %9 {offsets = [0, 3], sizes = [4, 1], strides = [1, 1]} : vector<4x4xf32> to vector<4x1xf32>
    %362 = vector.extract_strided_slice %343 {offsets = [3, 0], sizes = [1, 128], strides = [1, 1]} : vector<4x128xf32> to vector<1x128xf32>
    %363 = vector.broadcast %361 : vector<4x1xf32> to vector<4x128xf32>
    %364 = vector.broadcast %362 : vector<1x128xf32> to vector<4x128xf32>
    %365 = arith.mulf %363, %364 : vector<4x128xf32>
    %366 = arith.addf %360, %365 : vector<4x128xf32>
    %367 = vector.broadcast %10 : vector<4x1xf32> to vector<4x128xf32>
    %368 = arith.addf %366, %367 : vector<4x128xf32>
    %369 = math.tanh %368 : vector<4x128xf32>
    %370 = vector.extract_strided_slice %11 {offsets = [0, 0], sizes = [4, 1], strides = [1, 1]} : vector<4x4xf32> to vector<4x1xf32>
    %371 = vector.extract_strided_slice %293 {offsets = [0, 0], sizes = [1, 128], strides = [1, 1]} : vector<4x128xf32> to vector<1x128xf32>
    %372 = vector.broadcast %370 : vector<4x1xf32> to vector<4x128xf32>
    %373 = vector.broadcast %371 : vector<1x128xf32> to vector<4x128xf32>
    %374 = arith.mulf %372, %373 : vector<4x128xf32>
    %375 = vector.extract_strided_slice %11 {offsets = [0, 1], sizes = [4, 1], strides = [1, 1]} : vector<4x4xf32> to vector<4x1xf32>
    %376 = vector.extract_strided_slice %293 {offsets = [1, 0], sizes = [1, 128], strides = [1, 1]} : vector<4x128xf32> to vector<1x128xf32>
    %377 = vector.broadcast %375 : vector<4x1xf32> to vector<4x128xf32>
    %378 = vector.broadcast %376 : vector<1x128xf32> to vector<4x128xf32>
    %379 = arith.mulf %377, %378 : vector<4x128xf32>
    %380 = arith.addf %374, %379 : vector<4x128xf32>
    %381 = vector.extract_strided_slice %11 {offsets = [0, 2], sizes = [4, 1], strides = [1, 1]} : vector<4x4xf32> to vector<4x1xf32>
    %382 = vector.extract_strided_slice %293 {offsets = [2, 0], sizes = [1, 128], strides = [1, 1]} : vector<4x128xf32> to vector<1x128xf32>
    %383 = vector.broadcast %381 : vector<4x1xf32> to vector<4x128xf32>
    %384 = vector.broadcast %382 : vector<1x128xf32> to vector<4x128xf32>
    %385 = arith.mulf %383, %384 : vector<4x128xf32>
    %386 = arith.addf %380, %385 : vector<4x128xf32>
    %387 = vector.extract_strided_slice %11 {offsets = [0, 3], sizes = [4, 1], strides = [1, 1]} : vector<4x4xf32> to vector<4x1xf32>
    %388 = vector.extract_strided_slice %293 {offsets = [3, 0], sizes = [1, 128], strides = [1, 1]} : vector<4x128xf32> to vector<1x128xf32>
    %389 = vector.broadcast %387 : vector<4x1xf32> to vector<4x128xf32>
    %390 = vector.broadcast %388 : vector<1x128xf32> to vector<4x128xf32>
    %391 = arith.mulf %389, %390 : vector<4x128xf32>
    %392 = arith.addf %386, %391 : vector<4x128xf32>
    %393 = vector.broadcast %13 : vector<4x1xf32> to vector<4x128xf32>
    %394 = arith.addf %392, %393 : vector<4x128xf32>
    %395 = vector.extract_strided_slice %11 {offsets = [0, 0], sizes = [4, 1], strides = [1, 1]} : vector<4x4xf32> to vector<4x1xf32>
    %396 = vector.extract_strided_slice %268 {offsets = [0, 0], sizes = [1, 128], strides = [1, 1]} : vector<4x128xf32> to vector<1x128xf32>
    %397 = vector.broadcast %395 : vector<4x1xf32> to vector<4x128xf32>
    %398 = vector.broadcast %396 : vector<1x128xf32> to vector<4x128xf32>
    %399 = arith.mulf %397, %398 : vector<4x128xf32>
    %400 = vector.extract_strided_slice %11 {offsets = [0, 1], sizes = [4, 1], strides = [1, 1]} : vector<4x4xf32> to vector<4x1xf32>
    %401 = vector.extract_strided_slice %268 {offsets = [1, 0], sizes = [1, 128], strides = [1, 1]} : vector<4x128xf32> to vector<1x128xf32>
    %402 = vector.broadcast %400 : vector<4x1xf32> to vector<4x128xf32>
    %403 = vector.broadcast %401 : vector<1x128xf32> to vector<4x128xf32>
    %404 = arith.mulf %402, %403 : vector<4x128xf32>
    %405 = arith.addf %399, %404 : vector<4x128xf32>
    %406 = vector.extract_strided_slice %11 {offsets = [0, 2], sizes = [4, 1], strides = [1, 1]} : vector<4x4xf32> to vector<4x1xf32>
    %407 = vector.extract_strided_slice %268 {offsets = [2, 0], sizes = [1, 128], strides = [1, 1]} : vector<4x128xf32> to vector<1x128xf32>
    %408 = vector.broadcast %406 : vector<4x1xf32> to vector<4x128xf32>
    %409 = vector.broadcast %407 : vector<1x128xf32> to vector<4x128xf32>
    %410 = arith.mulf %408, %409 : vector<4x128xf32>
    %411 = arith.addf %405, %410 : vector<4x128xf32>
    %412 = vector.extract_strided_slice %11 {offsets = [0, 3], sizes = [4, 1], strides = [1, 1]} : vector<4x4xf32> to vector<4x1xf32>
    %413 = vector.extract_strided_slice %268 {offsets = [3, 0], sizes = [1, 128], strides = [1, 1]} : vector<4x128xf32> to vector<1x128xf32>
    %414 = vector.broadcast %412 : vector<4x1xf32> to vector<4x128xf32>
    %415 = vector.broadcast %413 : vector<1x128xf32> to vector<4x128xf32>
    %416 = arith.mulf %414, %415 : vector<4x128xf32>
    %417 = arith.addf %411, %416 : vector<4x128xf32>
    %418 = vector.broadcast %13 : vector<4x1xf32> to vector<4x128xf32>
    %419 = arith.addf %417, %418 : vector<4x128xf32>
    %420 = vector.extract_strided_slice %11 {offsets = [0, 0], sizes = [4, 1], strides = [1, 1]} : vector<4x4xf32> to vector<4x1xf32>
    %421 = vector.extract_strided_slice %243 {offsets = [0, 0], sizes = [1, 128], strides = [1, 1]} : vector<4x128xf32> to vector<1x128xf32>
    %422 = vector.broadcast %420 : vector<4x1xf32> to vector<4x128xf32>
    %423 = vector.broadcast %421 : vector<1x128xf32> to vector<4x128xf32>
    %424 = arith.mulf %422, %423 : vector<4x128xf32>
    %425 = vector.extract_strided_slice %11 {offsets = [0, 1], sizes = [4, 1], strides = [1, 1]} : vector<4x4xf32> to vector<4x1xf32>
    %426 = vector.extract_strided_slice %243 {offsets = [1, 0], sizes = [1, 128], strides = [1, 1]} : vector<4x128xf32> to vector<1x128xf32>
    %427 = vector.broadcast %425 : vector<4x1xf32> to vector<4x128xf32>
    %428 = vector.broadcast %426 : vector<1x128xf32> to vector<4x128xf32>
    %429 = arith.mulf %427, %428 : vector<4x128xf32>
    %430 = arith.addf %424, %429 : vector<4x128xf32>
    %431 = vector.extract_strided_slice %11 {offsets = [0, 2], sizes = [4, 1], strides = [1, 1]} : vector<4x4xf32> to vector<4x1xf32>
    %432 = vector.extract_strided_slice %243 {offsets = [2, 0], sizes = [1, 128], strides = [1, 1]} : vector<4x128xf32> to vector<1x128xf32>
    %433 = vector.broadcast %431 : vector<4x1xf32> to vector<4x128xf32>
    %434 = vector.broadcast %432 : vector<1x128xf32> to vector<4x128xf32>
    %435 = arith.mulf %433, %434 : vector<4x128xf32>
    %436 = arith.addf %430, %435 : vector<4x128xf32>
    %437 = vector.extract_strided_slice %11 {offsets = [0, 3], sizes = [4, 1], strides = [1, 1]} : vector<4x4xf32> to vector<4x1xf32>
    %438 = vector.extract_strided_slice %243 {offsets = [3, 0], sizes = [1, 128], strides = [1, 1]} : vector<4x128xf32> to vector<1x128xf32>
    %439 = vector.broadcast %437 : vector<4x1xf32> to vector<4x128xf32>
    %440 = vector.broadcast %438 : vector<1x128xf32> to vector<4x128xf32>
    %441 = arith.mulf %439, %440 : vector<4x128xf32>
    %442 = arith.addf %436, %441 : vector<4x128xf32>
    %443 = vector.broadcast %13 : vector<4x1xf32> to vector<4x128xf32>
    %444 = arith.addf %442, %443 : vector<4x128xf32>
    %445 = vector.extract_strided_slice %11 {offsets = [0, 0], sizes = [4, 1], strides = [1, 1]} : vector<4x4xf32> to vector<4x1xf32>
    %446 = vector.extract_strided_slice %218 {offsets = [0, 0], sizes = [1, 128], strides = [1, 1]} : vector<4x128xf32> to vector<1x128xf32>
    %447 = vector.broadcast %445 : vector<4x1xf32> to vector<4x128xf32>
    %448 = vector.broadcast %446 : vector<1x128xf32> to vector<4x128xf32>
    %449 = arith.mulf %447, %448 : vector<4x128xf32>
    %450 = vector.extract_strided_slice %11 {offsets = [0, 1], sizes = [4, 1], strides = [1, 1]} : vector<4x4xf32> to vector<4x1xf32>
    %451 = vector.extract_strided_slice %218 {offsets = [1, 0], sizes = [1, 128], strides = [1, 1]} : vector<4x128xf32> to vector<1x128xf32>
    %452 = vector.broadcast %450 : vector<4x1xf32> to vector<4x128xf32>
    %453 = vector.broadcast %451 : vector<1x128xf32> to vector<4x128xf32>
    %454 = arith.mulf %452, %453 : vector<4x128xf32>
    %455 = arith.addf %449, %454 : vector<4x128xf32>
    %456 = vector.extract_strided_slice %11 {offsets = [0, 2], sizes = [4, 1], strides = [1, 1]} : vector<4x4xf32> to vector<4x1xf32>
    %457 = vector.extract_strided_slice %218 {offsets = [2, 0], sizes = [1, 128], strides = [1, 1]} : vector<4x128xf32> to vector<1x128xf32>
    %458 = vector.broadcast %456 : vector<4x1xf32> to vector<4x128xf32>
    %459 = vector.broadcast %457 : vector<1x128xf32> to vector<4x128xf32>
    %460 = arith.mulf %458, %459 : vector<4x128xf32>
    %461 = arith.addf %455, %460 : vector<4x128xf32>
    %462 = vector.extract_strided_slice %11 {offsets = [0, 3], sizes = [4, 1], strides = [1, 1]} : vector<4x4xf32> to vector<4x1xf32>
    %463 = vector.extract_strided_slice %218 {offsets = [3, 0], sizes = [1, 128], strides = [1, 1]} : vector<4x128xf32> to vector<1x128xf32>
    %464 = vector.broadcast %462 : vector<4x1xf32> to vector<4x128xf32>
    %465 = vector.broadcast %463 : vector<1x128xf32> to vector<4x128xf32>
    %466 = arith.mulf %464, %465 : vector<4x128xf32>
    %467 = arith.addf %461, %466 : vector<4x128xf32>
    %468 = vector.broadcast %13 : vector<4x1xf32> to vector<4x128xf32>
    %469 = arith.addf %467, %468 : vector<4x128xf32>
    %470 = vector.extract_strided_slice %11 {offsets = [0, 0], sizes = [4, 1], strides = [1, 1]} : vector<4x4xf32> to vector<4x1xf32>
    %471 = vector.extract_strided_slice %193 {offsets = [0, 0], sizes = [1, 128], strides = [1, 1]} : vector<4x128xf32> to vector<1x128xf32>
    %472 = vector.broadcast %470 : vector<4x1xf32> to vector<4x128xf32>
    %473 = vector.broadcast %471 : vector<1x128xf32> to vector<4x128xf32>
    %474 = arith.mulf %472, %473 : vector<4x128xf32>
    %475 = vector.extract_strided_slice %11 {offsets = [0, 1], sizes = [4, 1], strides = [1, 1]} : vector<4x4xf32> to vector<4x1xf32>
    %476 = vector.extract_strided_slice %193 {offsets = [1, 0], sizes = [1, 128], strides = [1, 1]} : vector<4x128xf32> to vector<1x128xf32>
    %477 = vector.broadcast %475 : vector<4x1xf32> to vector<4x128xf32>
    %478 = vector.broadcast %476 : vector<1x128xf32> to vector<4x128xf32>
    %479 = arith.mulf %477, %478 : vector<4x128xf32>
    %480 = arith.addf %474, %479 : vector<4x128xf32>
    %481 = vector.extract_strided_slice %11 {offsets = [0, 2], sizes = [4, 1], strides = [1, 1]} : vector<4x4xf32> to vector<4x1xf32>
    %482 = vector.extract_strided_slice %193 {offsets = [2, 0], sizes = [1, 128], strides = [1, 1]} : vector<4x128xf32> to vector<1x128xf32>
    %483 = vector.broadcast %481 : vector<4x1xf32> to vector<4x128xf32>
    %484 = vector.broadcast %482 : vector<1x128xf32> to vector<4x128xf32>
    %485 = arith.mulf %483, %484 : vector<4x128xf32>
    %486 = arith.addf %480, %485 : vector<4x128xf32>
    %487 = vector.extract_strided_slice %11 {offsets = [0, 3], sizes = [4, 1], strides = [1, 1]} : vector<4x4xf32> to vector<4x1xf32>
    %488 = vector.extract_strided_slice %193 {offsets = [3, 0], sizes = [1, 128], strides = [1, 1]} : vector<4x128xf32> to vector<1x128xf32>
    %489 = vector.broadcast %487 : vector<4x1xf32> to vector<4x128xf32>
    %490 = vector.broadcast %488 : vector<1x128xf32> to vector<4x128xf32>
    %491 = arith.mulf %489, %490 : vector<4x128xf32>
    %492 = arith.addf %486, %491 : vector<4x128xf32>
    %493 = vector.broadcast %13 : vector<4x1xf32> to vector<4x128xf32>
    %494 = arith.addf %492, %493 : vector<4x128xf32>
    %495 = vector.extract_strided_slice %11 {offsets = [0, 0], sizes = [4, 1], strides = [1, 1]} : vector<4x4xf32> to vector<4x1xf32>
    %496 = vector.extract_strided_slice %168 {offsets = [0, 0], sizes = [1, 128], strides = [1, 1]} : vector<4x128xf32> to vector<1x128xf32>
    %497 = vector.broadcast %495 : vector<4x1xf32> to vector<4x128xf32>
    %498 = vector.broadcast %496 : vector<1x128xf32> to vector<4x128xf32>
    %499 = arith.mulf %497, %498 : vector<4x128xf32>
    %500 = vector.extract_strided_slice %11 {offsets = [0, 1], sizes = [4, 1], strides = [1, 1]} : vector<4x4xf32> to vector<4x1xf32>
    %501 = vector.extract_strided_slice %168 {offsets = [1, 0], sizes = [1, 128], strides = [1, 1]} : vector<4x128xf32> to vector<1x128xf32>
    %502 = vector.broadcast %500 : vector<4x1xf32> to vector<4x128xf32>
    %503 = vector.broadcast %501 : vector<1x128xf32> to vector<4x128xf32>
    %504 = arith.mulf %502, %503 : vector<4x128xf32>
    %505 = arith.addf %499, %504 : vector<4x128xf32>
    %506 = vector.extract_strided_slice %11 {offsets = [0, 2], sizes = [4, 1], strides = [1, 1]} : vector<4x4xf32> to vector<4x1xf32>
    %507 = vector.extract_strided_slice %168 {offsets = [2, 0], sizes = [1, 128], strides = [1, 1]} : vector<4x128xf32> to vector<1x128xf32>
    %508 = vector.broadcast %506 : vector<4x1xf32> to vector<4x128xf32>
    %509 = vector.broadcast %507 : vector<1x128xf32> to vector<4x128xf32>
    %510 = arith.mulf %508, %509 : vector<4x128xf32>
    %511 = arith.addf %505, %510 : vector<4x128xf32>
    %512 = vector.extract_strided_slice %11 {offsets = [0, 3], sizes = [4, 1], strides = [1, 1]} : vector<4x4xf32> to vector<4x1xf32>
    %513 = vector.extract_strided_slice %168 {offsets = [3, 0], sizes = [1, 128], strides = [1, 1]} : vector<4x128xf32> to vector<1x128xf32>
    %514 = vector.broadcast %512 : vector<4x1xf32> to vector<4x128xf32>
    %515 = vector.broadcast %513 : vector<1x128xf32> to vector<4x128xf32>
    %516 = arith.mulf %514, %515 : vector<4x128xf32>
    %517 = arith.addf %511, %516 : vector<4x128xf32>
    %518 = vector.broadcast %13 : vector<4x1xf32> to vector<4x128xf32>
    %519 = arith.addf %517, %518 : vector<4x128xf32>
    %520 = vector.broadcast %14 : vector<4x1xf32> to vector<4x128xf32>
    %521 = arith.mulf %520, %369 : vector<4x128xf32>
    %cst = arith.constant dense<0.000000e+00> : vector<128xf32>
    %522 = vector.multi_reduction <add>, %521, %cst [0] : vector<4x128xf32> to vector<128xf32>
    %523 = vector.shape_cast %522 : vector<128xf32> to vector<1x128xf32>
    %524 = arith.addf %523, %112 : vector<1x128xf32>
    %525 = vector.extract_strided_slice %12 {offsets = [0, 0], sizes = [4, 1], strides = [1, 1]} : vector<4x4xf32> to vector<4x1xf32>
    %526 = vector.extract_strided_slice %369 {offsets = [0, 0], sizes = [1, 128], strides = [1, 1]} : vector<4x128xf32> to vector<1x128xf32>
    %527 = vector.broadcast %525 : vector<4x1xf32> to vector<4x128xf32>
    %528 = vector.broadcast %526 : vector<1x128xf32> to vector<4x128xf32>
    %529 = arith.mulf %527, %528 : vector<4x128xf32>
    %530 = vector.extract_strided_slice %12 {offsets = [0, 1], sizes = [4, 1], strides = [1, 1]} : vector<4x4xf32> to vector<4x1xf32>
    %531 = vector.extract_strided_slice %369 {offsets = [1, 0], sizes = [1, 128], strides = [1, 1]} : vector<4x128xf32> to vector<1x128xf32>
    %532 = vector.broadcast %530 : vector<4x1xf32> to vector<4x128xf32>
    %533 = vector.broadcast %531 : vector<1x128xf32> to vector<4x128xf32>
    %534 = arith.mulf %532, %533 : vector<4x128xf32>
    %535 = arith.addf %529, %534 : vector<4x128xf32>
    %536 = vector.extract_strided_slice %12 {offsets = [0, 2], sizes = [4, 1], strides = [1, 1]} : vector<4x4xf32> to vector<4x1xf32>
    %537 = vector.extract_strided_slice %369 {offsets = [2, 0], sizes = [1, 128], strides = [1, 1]} : vector<4x128xf32> to vector<1x128xf32>
    %538 = vector.broadcast %536 : vector<4x1xf32> to vector<4x128xf32>
    %539 = vector.broadcast %537 : vector<1x128xf32> to vector<4x128xf32>
    %540 = arith.mulf %538, %539 : vector<4x128xf32>
    %541 = arith.addf %535, %540 : vector<4x128xf32>
    %542 = vector.extract_strided_slice %12 {offsets = [0, 3], sizes = [4, 1], strides = [1, 1]} : vector<4x4xf32> to vector<4x1xf32>
    %543 = vector.extract_strided_slice %369 {offsets = [3, 0], sizes = [1, 128], strides = [1, 1]} : vector<4x128xf32> to vector<1x128xf32>
    %544 = vector.broadcast %542 : vector<4x1xf32> to vector<4x128xf32>
    %545 = vector.broadcast %543 : vector<1x128xf32> to vector<4x128xf32>
    %546 = arith.mulf %544, %545 : vector<4x128xf32>
    %547 = arith.addf %541, %546 : vector<4x128xf32>
    %548 = arith.addf %547, %394 : vector<4x128xf32>
    %549 = math.tanh %548 : vector<4x128xf32>
    %550 = vector.broadcast %14 : vector<4x1xf32> to vector<4x128xf32>
    %551 = arith.mulf %550, %549 : vector<4x128xf32>
    %cst_3 = arith.constant dense<0.000000e+00> : vector<128xf32>
    %552 = vector.multi_reduction <add>, %551, %cst_3 [0] : vector<4x128xf32> to vector<128xf32>
    %553 = vector.shape_cast %552 : vector<128xf32> to vector<1x128xf32>
    %554 = arith.addf %553, %117 : vector<1x128xf32>
    %555 = vector.extract_strided_slice %12 {offsets = [0, 0], sizes = [4, 1], strides = [1, 1]} : vector<4x4xf32> to vector<4x1xf32>
    %556 = vector.extract_strided_slice %549 {offsets = [0, 0], sizes = [1, 128], strides = [1, 1]} : vector<4x128xf32> to vector<1x128xf32>
    %557 = vector.broadcast %555 : vector<4x1xf32> to vector<4x128xf32>
    %558 = vector.broadcast %556 : vector<1x128xf32> to vector<4x128xf32>
    %559 = arith.mulf %557, %558 : vector<4x128xf32>
    %560 = vector.extract_strided_slice %12 {offsets = [0, 1], sizes = [4, 1], strides = [1, 1]} : vector<4x4xf32> to vector<4x1xf32>
    %561 = vector.extract_strided_slice %549 {offsets = [1, 0], sizes = [1, 128], strides = [1, 1]} : vector<4x128xf32> to vector<1x128xf32>
    %562 = vector.broadcast %560 : vector<4x1xf32> to vector<4x128xf32>
    %563 = vector.broadcast %561 : vector<1x128xf32> to vector<4x128xf32>
    %564 = arith.mulf %562, %563 : vector<4x128xf32>
    %565 = arith.addf %559, %564 : vector<4x128xf32>
    %566 = vector.extract_strided_slice %12 {offsets = [0, 2], sizes = [4, 1], strides = [1, 1]} : vector<4x4xf32> to vector<4x1xf32>
    %567 = vector.extract_strided_slice %549 {offsets = [2, 0], sizes = [1, 128], strides = [1, 1]} : vector<4x128xf32> to vector<1x128xf32>
    %568 = vector.broadcast %566 : vector<4x1xf32> to vector<4x128xf32>
    %569 = vector.broadcast %567 : vector<1x128xf32> to vector<4x128xf32>
    %570 = arith.mulf %568, %569 : vector<4x128xf32>
    %571 = arith.addf %565, %570 : vector<4x128xf32>
    %572 = vector.extract_strided_slice %12 {offsets = [0, 3], sizes = [4, 1], strides = [1, 1]} : vector<4x4xf32> to vector<4x1xf32>
    %573 = vector.extract_strided_slice %549 {offsets = [3, 0], sizes = [1, 128], strides = [1, 1]} : vector<4x128xf32> to vector<1x128xf32>
    %574 = vector.broadcast %572 : vector<4x1xf32> to vector<4x128xf32>
    %575 = vector.broadcast %573 : vector<1x128xf32> to vector<4x128xf32>
    %576 = arith.mulf %574, %575 : vector<4x128xf32>
    %577 = arith.addf %571, %576 : vector<4x128xf32>
    %578 = arith.addf %577, %419 : vector<4x128xf32>
    %579 = math.tanh %578 : vector<4x128xf32>
    %580 = vector.broadcast %14 : vector<4x1xf32> to vector<4x128xf32>
    %581 = arith.mulf %580, %579 : vector<4x128xf32>
    %cst_4 = arith.constant dense<0.000000e+00> : vector<128xf32>
    %582 = vector.multi_reduction <add>, %581, %cst_4 [0] : vector<4x128xf32> to vector<128xf32>
    %583 = vector.shape_cast %582 : vector<128xf32> to vector<1x128xf32>
    %584 = arith.addf %583, %122 : vector<1x128xf32>
    %585 = vector.extract_strided_slice %12 {offsets = [0, 0], sizes = [4, 1], strides = [1, 1]} : vector<4x4xf32> to vector<4x1xf32>
    %586 = vector.extract_strided_slice %579 {offsets = [0, 0], sizes = [1, 128], strides = [1, 1]} : vector<4x128xf32> to vector<1x128xf32>
    %587 = vector.broadcast %585 : vector<4x1xf32> to vector<4x128xf32>
    %588 = vector.broadcast %586 : vector<1x128xf32> to vector<4x128xf32>
    %589 = arith.mulf %587, %588 : vector<4x128xf32>
    %590 = vector.extract_strided_slice %12 {offsets = [0, 1], sizes = [4, 1], strides = [1, 1]} : vector<4x4xf32> to vector<4x1xf32>
    %591 = vector.extract_strided_slice %579 {offsets = [1, 0], sizes = [1, 128], strides = [1, 1]} : vector<4x128xf32> to vector<1x128xf32>
    %592 = vector.broadcast %590 : vector<4x1xf32> to vector<4x128xf32>
    %593 = vector.broadcast %591 : vector<1x128xf32> to vector<4x128xf32>
    %594 = arith.mulf %592, %593 : vector<4x128xf32>
    %595 = arith.addf %589, %594 : vector<4x128xf32>
    %596 = vector.extract_strided_slice %12 {offsets = [0, 2], sizes = [4, 1], strides = [1, 1]} : vector<4x4xf32> to vector<4x1xf32>
    %597 = vector.extract_strided_slice %579 {offsets = [2, 0], sizes = [1, 128], strides = [1, 1]} : vector<4x128xf32> to vector<1x128xf32>
    %598 = vector.broadcast %596 : vector<4x1xf32> to vector<4x128xf32>
    %599 = vector.broadcast %597 : vector<1x128xf32> to vector<4x128xf32>
    %600 = arith.mulf %598, %599 : vector<4x128xf32>
    %601 = arith.addf %595, %600 : vector<4x128xf32>
    %602 = vector.extract_strided_slice %12 {offsets = [0, 3], sizes = [4, 1], strides = [1, 1]} : vector<4x4xf32> to vector<4x1xf32>
    %603 = vector.extract_strided_slice %579 {offsets = [3, 0], sizes = [1, 128], strides = [1, 1]} : vector<4x128xf32> to vector<1x128xf32>
    %604 = vector.broadcast %602 : vector<4x1xf32> to vector<4x128xf32>
    %605 = vector.broadcast %603 : vector<1x128xf32> to vector<4x128xf32>
    %606 = arith.mulf %604, %605 : vector<4x128xf32>
    %607 = arith.addf %601, %606 : vector<4x128xf32>
    %608 = arith.addf %607, %444 : vector<4x128xf32>
    %609 = math.tanh %608 : vector<4x128xf32>
    %610 = vector.broadcast %14 : vector<4x1xf32> to vector<4x128xf32>
    %611 = arith.mulf %610, %609 : vector<4x128xf32>
    %cst_5 = arith.constant dense<0.000000e+00> : vector<128xf32>
    %612 = vector.multi_reduction <add>, %611, %cst_5 [0] : vector<4x128xf32> to vector<128xf32>
    %613 = vector.shape_cast %612 : vector<128xf32> to vector<1x128xf32>
    %614 = arith.addf %613, %127 : vector<1x128xf32>
    %615 = vector.extract_strided_slice %12 {offsets = [0, 0], sizes = [4, 1], strides = [1, 1]} : vector<4x4xf32> to vector<4x1xf32>
    %616 = vector.extract_strided_slice %609 {offsets = [0, 0], sizes = [1, 128], strides = [1, 1]} : vector<4x128xf32> to vector<1x128xf32>
    %617 = vector.broadcast %615 : vector<4x1xf32> to vector<4x128xf32>
    %618 = vector.broadcast %616 : vector<1x128xf32> to vector<4x128xf32>
    %619 = arith.mulf %617, %618 : vector<4x128xf32>
    %620 = vector.extract_strided_slice %12 {offsets = [0, 1], sizes = [4, 1], strides = [1, 1]} : vector<4x4xf32> to vector<4x1xf32>
    %621 = vector.extract_strided_slice %609 {offsets = [1, 0], sizes = [1, 128], strides = [1, 1]} : vector<4x128xf32> to vector<1x128xf32>
    %622 = vector.broadcast %620 : vector<4x1xf32> to vector<4x128xf32>
    %623 = vector.broadcast %621 : vector<1x128xf32> to vector<4x128xf32>
    %624 = arith.mulf %622, %623 : vector<4x128xf32>
    %625 = arith.addf %619, %624 : vector<4x128xf32>
    %626 = vector.extract_strided_slice %12 {offsets = [0, 2], sizes = [4, 1], strides = [1, 1]} : vector<4x4xf32> to vector<4x1xf32>
    %627 = vector.extract_strided_slice %609 {offsets = [2, 0], sizes = [1, 128], strides = [1, 1]} : vector<4x128xf32> to vector<1x128xf32>
    %628 = vector.broadcast %626 : vector<4x1xf32> to vector<4x128xf32>
    %629 = vector.broadcast %627 : vector<1x128xf32> to vector<4x128xf32>
    %630 = arith.mulf %628, %629 : vector<4x128xf32>
    %631 = arith.addf %625, %630 : vector<4x128xf32>
    %632 = vector.extract_strided_slice %12 {offsets = [0, 3], sizes = [4, 1], strides = [1, 1]} : vector<4x4xf32> to vector<4x1xf32>
    %633 = vector.extract_strided_slice %609 {offsets = [3, 0], sizes = [1, 128], strides = [1, 1]} : vector<4x128xf32> to vector<1x128xf32>
    %634 = vector.broadcast %632 : vector<4x1xf32> to vector<4x128xf32>
    %635 = vector.broadcast %633 : vector<1x128xf32> to vector<4x128xf32>
    %636 = arith.mulf %634, %635 : vector<4x128xf32>
    %637 = arith.addf %631, %636 : vector<4x128xf32>
    %638 = arith.addf %637, %469 : vector<4x128xf32>
    %639 = math.tanh %638 : vector<4x128xf32>
    %640 = vector.broadcast %14 : vector<4x1xf32> to vector<4x128xf32>
    %641 = arith.mulf %640, %639 : vector<4x128xf32>
    %cst_6 = arith.constant dense<0.000000e+00> : vector<128xf32>
    %642 = vector.multi_reduction <add>, %641, %cst_6 [0] : vector<4x128xf32> to vector<128xf32>
    %643 = vector.shape_cast %642 : vector<128xf32> to vector<1x128xf32>
    %644 = arith.addf %643, %132 : vector<1x128xf32>
    %645 = vector.extract_strided_slice %12 {offsets = [0, 0], sizes = [4, 1], strides = [1, 1]} : vector<4x4xf32> to vector<4x1xf32>
    %646 = vector.extract_strided_slice %639 {offsets = [0, 0], sizes = [1, 128], strides = [1, 1]} : vector<4x128xf32> to vector<1x128xf32>
    %647 = vector.broadcast %645 : vector<4x1xf32> to vector<4x128xf32>
    %648 = vector.broadcast %646 : vector<1x128xf32> to vector<4x128xf32>
    %649 = arith.mulf %647, %648 : vector<4x128xf32>
    %650 = vector.extract_strided_slice %12 {offsets = [0, 1], sizes = [4, 1], strides = [1, 1]} : vector<4x4xf32> to vector<4x1xf32>
    %651 = vector.extract_strided_slice %639 {offsets = [1, 0], sizes = [1, 128], strides = [1, 1]} : vector<4x128xf32> to vector<1x128xf32>
    %652 = vector.broadcast %650 : vector<4x1xf32> to vector<4x128xf32>
    %653 = vector.broadcast %651 : vector<1x128xf32> to vector<4x128xf32>
    %654 = arith.mulf %652, %653 : vector<4x128xf32>
    %655 = arith.addf %649, %654 : vector<4x128xf32>
    %656 = vector.extract_strided_slice %12 {offsets = [0, 2], sizes = [4, 1], strides = [1, 1]} : vector<4x4xf32> to vector<4x1xf32>
    %657 = vector.extract_strided_slice %639 {offsets = [2, 0], sizes = [1, 128], strides = [1, 1]} : vector<4x128xf32> to vector<1x128xf32>
    %658 = vector.broadcast %656 : vector<4x1xf32> to vector<4x128xf32>
    %659 = vector.broadcast %657 : vector<1x128xf32> to vector<4x128xf32>
    %660 = arith.mulf %658, %659 : vector<4x128xf32>
    %661 = arith.addf %655, %660 : vector<4x128xf32>
    %662 = vector.extract_strided_slice %12 {offsets = [0, 3], sizes = [4, 1], strides = [1, 1]} : vector<4x4xf32> to vector<4x1xf32>
    %663 = vector.extract_strided_slice %639 {offsets = [3, 0], sizes = [1, 128], strides = [1, 1]} : vector<4x128xf32> to vector<1x128xf32>
    %664 = vector.broadcast %662 : vector<4x1xf32> to vector<4x128xf32>
    %665 = vector.broadcast %663 : vector<1x128xf32> to vector<4x128xf32>
    %666 = arith.mulf %664, %665 : vector<4x128xf32>
    %667 = arith.addf %661, %666 : vector<4x128xf32>
    %668 = arith.addf %667, %494 : vector<4x128xf32>
    %669 = math.tanh %668 : vector<4x128xf32>
    %670 = vector.broadcast %14 : vector<4x1xf32> to vector<4x128xf32>
    %671 = arith.mulf %670, %669 : vector<4x128xf32>
    %cst_7 = arith.constant dense<0.000000e+00> : vector<128xf32>
    %672 = vector.multi_reduction <add>, %671, %cst_7 [0] : vector<4x128xf32> to vector<128xf32>
    %673 = vector.shape_cast %672 : vector<128xf32> to vector<1x128xf32>
    %674 = arith.addf %673, %137 : vector<1x128xf32>
    %675 = vector.extract_strided_slice %12 {offsets = [0, 0], sizes = [4, 1], strides = [1, 1]} : vector<4x4xf32> to vector<4x1xf32>
    %676 = vector.extract_strided_slice %669 {offsets = [0, 0], sizes = [1, 128], strides = [1, 1]} : vector<4x128xf32> to vector<1x128xf32>
    %677 = vector.broadcast %675 : vector<4x1xf32> to vector<4x128xf32>
    %678 = vector.broadcast %676 : vector<1x128xf32> to vector<4x128xf32>
    %679 = arith.mulf %677, %678 : vector<4x128xf32>
    %680 = vector.extract_strided_slice %12 {offsets = [0, 1], sizes = [4, 1], strides = [1, 1]} : vector<4x4xf32> to vector<4x1xf32>
    %681 = vector.extract_strided_slice %669 {offsets = [1, 0], sizes = [1, 128], strides = [1, 1]} : vector<4x128xf32> to vector<1x128xf32>
    %682 = vector.broadcast %680 : vector<4x1xf32> to vector<4x128xf32>
    %683 = vector.broadcast %681 : vector<1x128xf32> to vector<4x128xf32>
    %684 = arith.mulf %682, %683 : vector<4x128xf32>
    %685 = arith.addf %679, %684 : vector<4x128xf32>
    %686 = vector.extract_strided_slice %12 {offsets = [0, 2], sizes = [4, 1], strides = [1, 1]} : vector<4x4xf32> to vector<4x1xf32>
    %687 = vector.extract_strided_slice %669 {offsets = [2, 0], sizes = [1, 128], strides = [1, 1]} : vector<4x128xf32> to vector<1x128xf32>
    %688 = vector.broadcast %686 : vector<4x1xf32> to vector<4x128xf32>
    %689 = vector.broadcast %687 : vector<1x128xf32> to vector<4x128xf32>
    %690 = arith.mulf %688, %689 : vector<4x128xf32>
    %691 = arith.addf %685, %690 : vector<4x128xf32>
    %692 = vector.extract_strided_slice %12 {offsets = [0, 3], sizes = [4, 1], strides = [1, 1]} : vector<4x4xf32> to vector<4x1xf32>
    %693 = vector.extract_strided_slice %669 {offsets = [3, 0], sizes = [1, 128], strides = [1, 1]} : vector<4x128xf32> to vector<1x128xf32>
    %694 = vector.broadcast %692 : vector<4x1xf32> to vector<4x128xf32>
    %695 = vector.broadcast %693 : vector<1x128xf32> to vector<4x128xf32>
    %696 = arith.mulf %694, %695 : vector<4x128xf32>
    %697 = arith.addf %691, %696 : vector<4x128xf32>
    %698 = arith.addf %697, %519 : vector<4x128xf32>
    %699 = math.tanh %698 : vector<4x128xf32>
    %700 = vector.broadcast %14 : vector<4x1xf32> to vector<4x128xf32>
    %701 = arith.mulf %700, %699 : vector<4x128xf32>
    %cst_8 = arith.constant dense<0.000000e+00> : vector<128xf32>
    %702 = vector.multi_reduction <add>, %701, %cst_8 [0] : vector<4x128xf32> to vector<128xf32>
    %703 = vector.shape_cast %702 : vector<128xf32> to vector<1x128xf32>
    %704 = arith.addf %703, %142 : vector<1x128xf32>
    %705 = tpu.concatenate %524, %554, %584, %614, %644, %674, %704 in 0 : vector<1x128xf32>, vector<1x128xf32>, vector<1x128xf32>, vector<1x128xf32>, vector<1x128xf32>, vector<1x128xf32>, vector<1x128xf32> -> vector<7x128xf32>
    %c0_9 = arith.constant 0 : index
    %c0_10 = arith.constant 0 : index
    %706 = vector.load %arg3[%c0_9, %c0_10] : memref<7x128xf32, #tpu.memory_space<vmem>>, vector<7x128xf32>
    tpu.vector_store %arg3[%c0_9, %c0_10], %705 {strides = array<i32>} : memref<7x128xf32, #tpu.memory_space<vmem>>, vector<7x128xf32>,
    return
  }
  func.func @transform_0(%arg0: i32) -> (i32, i32) {
    %c0_i32 = arith.constant 0 : i32
    %c0_i32_0 = arith.constant 0 : i32
    %c0_i32_1 = arith.constant 0 : i32
    return %c0_i32, %c0_i32_0 : i32, i32
  }
  func.func @transform_1(%arg0: i32) -> (i32, i32) {
    %c0_i32 = arith.constant 0 : i32
    %c0_i32_0 = arith.constant 0 : i32
    return %c0_i32, %arg0 : i32, i32
  }
  func.func @transform_2(%arg0: i32) -> (i32, i32) {
    %c0_i32 = arith.constant 0 : i32
    %c0_i32_0 = arith.constant 0 : i32
    return %c0_i32, %arg0 : i32, i32
  }
}

</mosaic_0001>

<bundles_post_ra>
// kernel: rec_policy_forward.1
= control target key start
LH: loop header
LB: loop body
LE: loop exit
PB: predicated region body
PF: predicated region fallthrough
CT: control target
= control target key end

     0   :  { %v655_v0 = vmov 3   ;;  %v656_v1 = vmov 6   ;;  %v657_v3 = vmov 0   ;;  %v658_v4 = vmov 4   ;;  %s1022_s0 = inlined_call_operand.vmem [shape: f32[8,128], index: 0, kind: input, shape index: {}]   ;;  %s1023_s1 = inlined_call_operand.vmem [shape: f32[18,128], index: 1, kind: input, shape index: {}]   ;;  %s1024_s2 = inlined_call_operand.vmem [shape: f32[7,128], index: 2, kind: output, shape index: {}]  }
   0x1   :  { %596 = vset.pattern.permute.xlu2 %v655_v0  ;;  %594 = vset.pattern.permute.xlu1 %v656_v1  ;;  %v706_v2 = vld [vmem:[%s1022_s0] sm:$0xff]  ;;  %v659_v5 = vmov 2   ;;  %v660_v6 = vmov 1   ;;  %v661_v7 = vmov 8   ;;  %v662_v8 = vmov 5   ;;  %v751_v33 = vld [vmem:[%s1023_s1 + $0x8] sm:$0xff] }
   0x2   :  { %592 = vset.pattern.permute.xlu0 %v657_v3  ;;  %114 = vperm.xlu2 %596, %v706_v2   ;;  %v663_v9 = vmov 9   ;;  %v664_v10 = vmov 13   ;;  %v665_v11 = vmov 12   ;;  %v666_v12 = vmov 11   ;;  %v746_v32 = vld [vmem:[%s1023_s1] sm:$0xff] }
   0x3   :  { %30 = vperm.xlu1 %594, %v706_v2   ;;  %17 = vperm.xlu0 %592, %v706_v2   ;;  %v667_v13 = vmov 14   ;;  %v668_v14 = vmov 10   ;;  %v669_v15 = vmov 19   ;;  %v670_v16 = vmov 16   ;;  %v14_v34 = vld [vmem:[%s1023_s1 + $0x10] sm:$0x3] }
   0x4   :  { %v671_v17 = vmov 15   ;;  %v672_v18 = vmov 24   ;;  %v673_v19 = vmov 18   ;;  %v674_v20 = vmov 17  }
   0x5   :  { %v675_v21 = vmov 21   ;;  %v676_v22 = vmov 20   ;;  %v677_v23 = vmov 23   ;;  %v678_v24 = vmov 22  }
   0x6   :  { %v679_v25 = vmov 26   ;;  %v680_v26 = vmov 25   ;;  %v681_v27 = vmov 30   ;;  %v20_v35 = vperm.slane %v746_v32, 4 }
   0x7   :  { %v34_v36 = vperm.slane %v746_v32, 5  ;;  %v40_v37 = vperm.slane %v746_v32, 6  ;;  %v26_v38 = vperm.slane %v751_v33, 3  ;;  %v36_v39 = vperm.slane %v751_v33, 4 }
   0x8   :  { %v42_v40 = vperm.slane %v751_v33, 5  ;;  %v64_v41 = vperm.slane %v751_v33, 2  ;;  %v66_v42 = vperm.slane %v14_v34, 1  ;;  %v60_v0 = vperm.slane %v14_v34, 0 }
   0x9   :  { %v58_v1 = vperm.slane %v751_v33, 1  ;;  %vm368_vm0 = vcmask 1043456   ;;  %vm543_vm1 = vcmask 1040384   ;;  %vm545_vm2 = vcmask 1041408  }
   0xa   :  { %597 = vset.pattern.permute.xlu2 %v658_v4  ;;  %vm547_vm3 = vcmask 1042432   ;;  %vm550_vm4 = vcmask 1044480   ;;  %vm552_vm5 = vcmask 1045504  }
   0xb   :  { %595 = vset.pattern.permute.xlu1 %v659_v5  ;;  %593 = vset.pattern.permute.xlu0 %v660_v6 }
   0xc   :  { %121 = vperm.xlu2 %597, %v706_v2   ;;  %108 = vperm.xlu1 %595, %v706_v2  }
   0xd   :  { %23 = vperm.xlu0 %593, %v706_v2  }
  0x14   :  { %599 = vset.pattern.permute.xlu2 %v661_v7  ;;  %598 = vset.pattern.permute.xlu1 %v662_v8 }
  0x15   :  { %600 = vset.pattern.permute.xlu0 %v663_v9  ;;  %202 = vperm.xlu2 %599, %v706_v2  }
  0x16   :  { %128 = vperm.xlu1 %598, %v706_v2   ;;  %208 = vperm.xlu0 %600, %v706_v2  }
  0x1d   :  { %602 = vset.pattern.permute.xlu2 %v664_v10 }
  0x1e   :  { %601 = vset.pattern.permute.xlu1 %v665_v11  ;;  %605 = vset.pattern.permute.xlu0 %v666_v12 }
  0x1f   :  { %235 = vperm.xlu2 %602, %v706_v2   ;;  %229 = vperm.xlu1 %601, %v706_v2  }
  0x20   :  { %222 = vperm.xlu0 %605, %v706_v2  }
  0x27   :  { %604 = vset.pattern.permute.xlu2 %v667_v13  ;;  %603 = vset.pattern.permute.xlu1 %v668_v14 }
  0x28   :  { %610 = vset.pattern.permute.xlu0 %v669_v15  ;;  %242 = vperm.xlu2 %604, %v706_v2  }
  0x29   :  { %215 = vperm.xlu1 %603, %v706_v2   ;;  %276 = vperm.xlu0 %610, %v706_v2  }
  0x30   :  { %607 = vset.pattern.permute.xlu2 %v670_v16 }
  0x31   :  { %606 = vset.pattern.permute.xlu1 %v671_v17  ;;  %615 = vset.pattern.permute.xlu0 %v672_v18 }
  0x32   :  { %257 = vperm.xlu2 %607, %v706_v2   ;;  %249 = vperm.xlu1 %606, %v706_v2  }
  0x33   :  { %307 = vperm.xlu0 %615, %v706_v2  }
  0x3a   :  { %609 = vset.pattern.permute.xlu2 %v673_v19  ;;  %608 = vset.pattern.permute.xlu1 %v674_v20 }
  0x3b   :  { %269 = vperm.xlu2 %609, %v706_v2   ;;  %263 = vperm.xlu1 %608, %v706_v2  }
  0x43   :  { %612 = vset.pattern.permute.xlu2 %v675_v21  ;;  %611 = vset.pattern.permute.xlu1 %v676_v22  ;;  %v682_v21 = vmov 29  }
  0x44   :  { %290 = vperm.xlu2 %612, %v706_v2   ;;  %283 = vperm.xlu1 %611, %v706_v2  }
  0x45   :  { %620 = vset.pattern.permute.xlu0 %v682_v21 }
  0x46   :  { %398 = vperm.xlu0 %620, %v706_v2  }
  0x4c   :  { %614 = vset.pattern.permute.xlu2 %v677_v23  ;;  %613 = vset.pattern.permute.xlu1 %v678_v24  ;;  %v683_v24 = vmov 27  }
  0x4d   :  { %301 = vperm.xlu2 %614, %v706_v2   ;;  %296 = vperm.xlu1 %613, %v706_v2  }
  0x55   :  { %616 = vset.pattern.permute.xlu1 %v679_v25  ;;  %617 = vset.pattern.permute.xlu2 %v683_v24  ;;  %v54_v25 = vperm.slane %v751_v33, 7 }
  0x56   :  { %378 = vperm.xlu1 %616, %v706_v2   ;;  %384 = vperm.xlu2 %617, %v706_v2  }
  0x5c   :  { %v735_v28 = vpop.permute.xlu2 %114 }
  0x5e   :  { %618 = vset.pattern.permute.xlu1 %v680_v26 }
  0x5f   :  { %313 = vperm.xlu1 %618, %v706_v2  }
  0x66   :  { %v741_v31 = vpop.permute.xlu2 %121 }
  0x67   :  { %621 = vset.pattern.permute.xlu1 %v681_v27  ;;  %v52_v27 = vperm.slane %v751_v33, 0 }
  0x68   :  { %319 = vperm.xlu1 %621, %v706_v2  }
  0x6f   :  { %v769_v47 = vpop.permute.xlu2 %202 }
  0x75   :  { %v737_v29 = vpop.permute.xlu0 %17  ;;  %v739_v30 = vpop.permute.xlu1 %30 }
  0x76   :  { %v21_v44 = vmul.f32 %v20_v35, %v737_v29  ;;  %v35_v45 = vmul.f32 %v34_v36, %v737_v29  ;;  %v41_v48 = vmul.f32 %v40_v37, %v737_v29  ;;  %v65_v52 = vmul.f32 %v64_v41, %v737_v29 }
  0x77   :  { %v59_v8 = vmul.f32 %v58_v1, %v737_v29  ;;  %v684_v35 = vmov 32   ;;  %v53_v41 = vmul.f32 %v52_v27, %v737_v29 }
  0x78   :  { %623 = vset.pattern.permute.xlu1 %v684_v35 }
  0x79   :  { %v789_v63 = vpop.permute.xlu2 %235  ;;  %71 = vperm.xlu1 %623, %v706_v2  }
  0x7e   :  { %v763_v43 = vpop.permute.xlu1 %108 }
  0x7f   :  { %v767_v46 = vpop.permute.xlu0 %23 }
  0x80   :  { %v27_v49 = vmul.f32 %v26_v38, %v767_v46  ;;  %v37_v50 = vmul.f32 %v36_v39, %v767_v46  ;;  %v43_v51 = vmul.f32 %v42_v40, %v767_v46  ;;  %v67_v53 = vmul.f32 %v66_v42, %v767_v46 }
  0x81   :  { %v61_v4 = vmul.f32 %v60_v0, %v767_v46  ;;  %v55_v36 = vmul.f32 %v54_v25, %v767_v46  ;;  %v687_v25 = vmov 33  }
  0x82   :  { %v28_v54 = vadd.f32 %v27_v49, %v21_v44  ;;  %v38_v55 = vadd.f32 %v37_v50, %v35_v45  ;;  %v44_v56 = vadd.f32 %v43_v51, %v41_v48  ;;  %v68_v57 = vadd.f32 %v67_v53, %v65_v52  ;;  %v799_v16 = vpop.permute.xlu2 %242 }
  0x83   :  { %v62_v13 = vadd.f32 %v61_v4, %v59_v8  ;;  %v56_v49 = vadd.f32 %v55_v36, %v53_v41  ;;  %v685_v52 = vmov 28   ;;  %v48_v4 = vperm.slane %v751_v33, 6 }
  0x84   :  { %v778_v58 = vadd.f32 %v739_v30, %v28_v54  ;;  %v781_v59 = vadd.f32 %v38_v55, %v739_v30  ;;  %v784_v60 = vadd.f32 %v44_v56, %v739_v30  ;;  %v69_v61 = vadd.f32 %v68_v57, %v739_v30  ;;  %619 = vset.pattern.permute.xlu2 %v685_v52 }
  0x85   :  { %v63_v19 = vadd.f32 %v62_v13, %v739_v30  ;;  %391 = vperm.xlu2 %619, %v706_v2   ;;  %v57_v56 = vadd.f32 %v56_v49, %v739_v30  ;;  %v49_v8 = vmul.f32 %v48_v4, %v767_v46 }
  0x86   :  { %625 = vtanh.f32 %v69_v61 }
  0x88   :  { %v787_v62 = vpop.permute.xlu1 %128  ;;  %v814_v37 = vpop.permute.xlu0 %208 }
  0x8c   :  { %v626_v3 = vpop.eup %625  ;;  %v808_v26 = vpop.permute.xlu2 %257 }
  0x8d   :  { %v111_v5 = vperm.slane %v626_v3, 0  ;;  %v117_v6 = vperm.slane %v626_v3, 1  ;;  %v124_v7 = vperm.slane %v626_v3, 2  ;;  %v131_v11 = vperm.slane %v626_v3, 3 }
  0x8e   :  { %v686_v3 = vmov 31  }
  0x8f   :  { %v112_v9 = vmul.f32 %v111_v5, %v763_v43  ;;  %v118_v10 = vmul.f32 %v117_v6, %v735_v28  ;;  %v125_v15 = vmul.f32 %v124_v7, %v741_v31  ;;  %v132_v18 = vmul.f32 %v131_v11, %v787_v62  ;;  %622 = vset.pattern.permute.xlu2 %v686_v3 }
  0x90   :  { %364 = vperm.xlu2 %622, %v706_v2   ;;  %v46_v5 = vperm.slane %v746_v32, 7 }
  0x91   :  { %v796_v12 = vpop.permute.xlu1 %229  ;;  %v119_v14 = vadd.f32 %v118_v10, %v112_v9 }
  0x92   :  { %v834_v0 = vpop.permute.xlu0 %222 }
  0x93   :  { %v126_v17 = vadd.f32 %v125_v15, %v119_v14  ;;  %v47_v14 = vmul.f32 %v46_v5, %v737_v29 }
  0x95   :  { %v133_v20 = vadd.f32 %v132_v18, %v126_v17  ;;  %v831_v55 = vpop.permute.xlu2 %269 }
  0x97   :  { %v134_v22 = vadd.f32 %v133_v20, %v63_v19  ;;  %v50_v20 = vadd.f32 %v49_v8, %v47_v14 }
  0x98   :  { %624 = vset.pattern.permute.xlu2 %v687_v25 }
  0x99   :  { %627 = vtanh.f32 %v134_v22  ;;  %v51_v27 = vadd.f32 %v50_v20, %v739_v30  ;;  %79 = vperm.xlu2 %624, %v706_v2  }
  0x9b   :  { %v804_v23 = vpop.permute.xlu1 %215  ;;  %v844_v13 = vpop.permute.xlu0 %276 }
  0x9e   :  { %v841_v6 = vpop.permute.xlu2 %290 }
  0x9f   :  { %v811_v34 = vpop.eup %627 }
  0xa0   :  { %v136_v38 = vperm.slane %v811_v34, 0  ;;  %v138_v39 = vperm.slane %v811_v34, 1  ;;  %v141_v40 = vperm.slane %v811_v34, 2  ;;  %v144_v45 = vperm.slane %v811_v34, 3 }
  0xa2   :  { %v137_v42 = vmul.f32 %v136_v38, %v763_v43  ;;  %v139_v44 = vmul.f32 %v138_v39, %v735_v28  ;;  %v142_v51 = vmul.f32 %v141_v40, %v741_v31  ;;  %v145_v54 = vmul.f32 %v144_v45, %v787_v62 }
  0xa4   :  { %v824_v48 = vpop.permute.xlu1 %249  ;;  %v140_v50 = vadd.f32 %v139_v44, %v137_v42 }
  0xa5   :  { %v857_v41 = vpop.permute.xlu0 %307 }
  0xa6   :  { %v143_v53 = vadd.f32 %v142_v51, %v140_v50  ;;  %v358_v52 = vmul.f32 %v857_v41, %v141_v40 }
  0xa7   :  { %v854_v29 = vpop.permute.xlu2 %301 }
  0xa8   :  { %v146_v57 = vadd.f32 %v145_v54, %v143_v53  ;;  %v356_v42 = vmul.f32 %v854_v29, %v138_v39 }
  0xaa   :  { %v147_v61 = vadd.f32 %v146_v57, %v57_v56 }
  0xac   :  { %629 = vtanh.f32 %v147_v61 }
  0xad   :  { %v836_v1 = vpop.permute.xlu1 %263 }
  0xb2   :  { %v630_v7 = vpop.eup %629 }
  0xb3   :  { %v149_v9 = vperm.slane %v630_v7, 0  ;;  %v151_v10 = vperm.slane %v630_v7, 1  ;;  %v154_v11 = vperm.slane %v630_v7, 2  ;;  %v157_v18 = vperm.slane %v630_v7, 3 }
  0xb5   :  { %v150_v15 = vmul.f32 %v149_v9, %v763_v43  ;;  %v152_v17 = vmul.f32 %v151_v10, %v735_v28  ;;  %v155_v22 = vmul.f32 %v154_v11, %v741_v31  ;;  %v158_v46 = vmul.f32 %v157_v18, %v787_v62 }
  0xb6   :  { %v849_v19 = vpop.permute.xlu1 %283  ;;  %v348_v49 = vmul.f32 %v854_v29, %v151_v10  ;;  %v350_v30 = vmul.f32 %v857_v41, %v154_v11 }
  0xb7   :  { %v153_v21 = vadd.f32 %v152_v17, %v150_v15 }
  0xb9   :  { %v156_v24 = vadd.f32 %v155_v22, %v153_v21 }
  0xbb   :  { %v159_v35 = vadd.f32 %v158_v46, %v156_v24 }
  0xbd   :  { %v160_v36 = vadd.f32 %v159_v35, %v51_v27 }
  0xbf   :  { %v860_v44 = vpop.permute.xlu1 %296  ;;  %631 = vtanh.f32 %v160_v36 }
  0xc0   :  { %v347_v50 = vmul.f32 %v860_v44, %v149_v9  ;;  %v355_v51 = vmul.f32 %v860_v44, %v136_v38 }
  0xc2   :  { %v349_v53 = vadd.f32 %v348_v49, %v347_v50  ;;  %v357_v2 = vadd.f32 %v356_v42, %v355_v51 }
  0xc4   :  { %v351_v54 = vadd.f32 %v350_v30, %v349_v53  ;;  %v359_v56 = vadd.f32 %v358_v52, %v357_v2 }
  0xc5   :  { %v632_v57 = vpop.eup %631 }
  0xc6   :  { %v162_v61 = vperm.slane %v632_v57, 0  ;;  %v164_v39 = vperm.slane %v632_v57, 1  ;;  %v167_v3 = vperm.slane %v632_v57, 2  ;;  %v170_v8 = vperm.slane %v632_v57, 3 }
  0xc8   :  { %v867_v4 = vpop.permute.xlu1 %378  ;;  %v163_v5 = vmul.f32 %v162_v61, %v763_v43  ;;  %v165_v7 = vmul.f32 %v164_v39, %v735_v28  ;;  %v340_v38 = vmul.f32 %v854_v29, %v164_v39  ;;  %v168_v40 = vmul.f32 %v167_v3, %v741_v31 }
  0xc9   :  { %v339_v10 = vmul.f32 %v860_v44, %v162_v61  ;;  %v171_v14 = vmul.f32 %v170_v8, %v787_v62  ;;  %v342_v15 = vmul.f32 %v857_v41, %v167_v3 }
  0xca   :  { %v166_v9 = vadd.f32 %v165_v7, %v163_v5 }
  0xcb   :  { %v341_v17 = vadd.f32 %v340_v38, %v339_v10 }
  0xcc   :  { %v169_v11 = vadd.f32 %v168_v40, %v166_v9 }
  0xcd   :  { %v343_v21 = vadd.f32 %v342_v15, %v341_v17 }
  0xce   :  { %v172_v20 = vadd.f32 %v171_v14, %v169_v11 }
  0xd0   :  { %v173_v22 = vadd.f32 %v172_v20, %v784_v60 }
  0xd1   :  { %v877_v24 = vpop.permute.xlu1 %313 }
  0xd2   :  { %v344_v46 = vmul.f32 %v877_v24, %v170_v8  ;;  %v352_v25 = vmul.f32 %v877_v24, %v157_v18  ;;  %v360_v27 = vmul.f32 %v877_v24, %v144_v45  ;;  %633 = vtanh.f32 %v173_v22 }
  0xd4   :  { %v884_v35 = vadd.f32 %v344_v46, %v343_v21  ;;  %v353_v36 = vadd.f32 %v352_v25, %v351_v54  ;;  %v361_v42 = vadd.f32 %v360_v27, %v359_v56 }
  0xd8   :  { %v634_v49 = vpop.eup %633 }
  0xd9   :  { %v175_v50 = vperm.slane %v634_v49, 0  ;;  %v177_v51 = vperm.slane %v634_v49, 1  ;;  %v180_v30 = vperm.slane %v634_v49, 2  ;;  %v183_v53 = vperm.slane %v634_v49, 3 }
  0xda   :  { %v886_v60 = vpop.permute.xlu1 %319 }
  0xdb   :  { %v889_v52 = vadd.f32 %v353_v36, %v886_v60  ;;  %v892_v18 = vadd.f32 %v361_v42, %v886_v60  ;;  %v176_v34 = vmul.f32 %v175_v50, %v763_v43  ;;  %v178_v45 = vmul.f32 %v177_v51, %v735_v28 }
  0xdc   :  { %v332_v2 = vmul.f32 %v854_v29, %v177_v51  ;;  %v331_v54 = vmul.f32 %v860_v44, %v175_v50  ;;  %v181_v57 = vmul.f32 %v180_v30, %v741_v31  ;;  %v334_v61 = vmul.f32 %v857_v41, %v180_v30 }
  0xdd   :  { %v179_v56 = vadd.f32 %v178_v45, %v176_v34  ;;  %v184_v5 = vmul.f32 %v183_v53, %v787_v62  ;;  %v336_v7 = vmul.f32 %v877_v24, %v183_v53  ;;  %v211_v34 = vperm.slane %v746_v32, 1 }
  0xde   :  { %v333_v39 = vadd.f32 %v332_v2, %v331_v54  ;;  %v218_v2 = vperm.slane %v746_v32, 2 }
  0xdf   :  { %v182_v3 = vadd.f32 %v181_v57, %v179_v56  ;;  %v212_v53 = vmul.f32 %v211_v34, %v814_v37  ;;  %v225_v56 = vperm.slane %v746_v32, 3 }
  0xe0   :  { %v335_v8 = vadd.f32 %v334_v61, %v333_v39  ;;  %v219_v39 = vmul.f32 %v218_v2, %v804_v23 }
  0xe1   :  { %v185_v38 = vadd.f32 %v184_v5, %v182_v3 }
  0xe2   :  { %v902_v9 = vadd.f32 %v336_v7, %v335_v8 }
  0xe3   :  { %v186_v40 = vadd.f32 %v185_v38, %v781_v59 }
  0xe5   :  { %635 = vtanh.f32 %v186_v40 }
  0xeb   :  { %v636_v10 = vpop.eup %635 }
  0xec   :  { %v188_v11 = vperm.slane %v636_v10, 0  ;;  %v190_v14 = vperm.slane %v636_v10, 1  ;;  %v193_v15 = vperm.slane %v636_v10, 2  ;;  %v196_v21 = vperm.slane %v636_v10, 3 }
  0xee   :  { %v189_v17 = vmul.f32 %v188_v11, %v763_v43  ;;  %v191_v20 = vmul.f32 %v190_v14, %v735_v28  ;;  %v324_v22 = vmul.f32 %v854_v29, %v190_v14  ;;  %v323_v46 = vmul.f32 %v860_v44, %v188_v11 }
  0xef   :  { %v194_v27 = vmul.f32 %v193_v15, %v741_v31  ;;  %v326_v36 = vmul.f32 %v857_v41, %v193_v15  ;;  %v197_v49 = vmul.f32 %v196_v21, %v787_v62  ;;  %v328_v50 = vmul.f32 %v877_v24, %v196_v21 }
  0xf0   :  { %v192_v25 = vadd.f32 %v191_v20, %v189_v17  ;;  %v325_v59 = vadd.f32 %v324_v22, %v323_v46  ;;  %v205_v28 = vperm.slane %v746_v32, 0  ;;  %v931_v46 = vpop.permute.xlu2 %384 }
  0xf2   :  { %v195_v42 = vadd.f32 %v194_v27, %v192_v25  ;;  %v327_v51 = vadd.f32 %v326_v36, %v325_v59  ;;  %v206_v31 = vmul.f32 %v205_v28, %v769_v47  ;;  %v226_v47 = vmul.f32 %v225_v56, %v834_v0 }
  0xf4   :  { %v198_v43 = vadd.f32 %v197_v49, %v195_v42  ;;  %v913_v30 = vadd.f32 %v328_v50, %v327_v51  ;;  %v213_v54 = vadd.f32 %v212_v53, %v206_v31 }
  0xf6   :  { %v199_v45 = vadd.f32 %v198_v43, %v778_v58  ;;  %v220_v37 = vadd.f32 %v219_v39, %v213_v54 }
  0xf8   :  { %637 = vtanh.f32 %v199_v45  ;;  %v227_v11 = vadd.f32 %v226_v47, %v220_v37 }
  0xfe   :  { %v638_v62 = vpop.eup %637 }
  0xff   :  { %v232_v57 = vperm.slane %v638_v62, 0  ;;  %v238_v61 = vperm.slane %v638_v62, 1  ;;  %v245_v3 = vperm.slane %v638_v62, 2  ;;  %v252_v7 = vperm.slane %v638_v62, 3 }
 0x101   :  { %v233_v5 = vmul.f32 %v232_v57, %v796_v12  ;;  %v239_v58 = vmul.f32 %v238_v61, %v789_v63  ;;  %v246_v38 = vmul.f32 %v245_v3, %v799_v16  ;;  %v253_v10 = vmul.f32 %v252_v7, %v824_v48 }
 0x102   :  { %v304_v59 = vmul.f32 %v854_v29, %v238_v61  ;;  %v299_v42 = vmul.f32 %v860_v44, %v232_v57  ;;  %v310_v49 = vmul.f32 %v857_v41, %v245_v3  ;;  %v316_v34 = vmul.f32 %v877_v24, %v252_v7  ;;  %v946_v44 = vpop.permute.xlu0 %398 }
 0x103   :  { %v240_v8 = vadd.f32 %v239_v58, %v233_v5 }
 0x105   :  { %v247_v40 = vadd.f32 %v246_v38, %v240_v8 }
 0x107   :  { %v254_v14 = vadd.f32 %v253_v10, %v247_v40 }
 0x109   :  { %v255_v15 = vadd.f32 %v254_v14, %v227_v11 }
 0x10b   :  { %v260_v23 = vadd.f32 %v808_v26, %v255_v15 }
 0x10d   :  { %639 = vtanh.f32 %v260_v23  ;;  %v83_v23 = vrot.slane %v746_v32, 5 }
 0x113   :  { %v640_v17 = vpop.eup %639 }
 0x114   :  { %v266_v12 = vperm.slane %v640_v17, 0  ;;  %v272_v20 = vperm.slane %v640_v17, 1  ;;  %v279_v63 = vperm.slane %v640_v17, 2  ;;  %v286_v22 = vperm.slane %v640_v17, 3 }
 0x116   :  { %v267_v21 = vmul.f32 %v266_v12, %v836_v1  ;;  %v273_v0 = vmul.f32 %v272_v20, %v831_v55  ;;  %v280_v48 = vmul.f32 %v279_v63, %v844_v13  ;;  %v287_v27 = vmul.f32 %v286_v22, %v849_v19  ;;  %v938_v1 = vpop.permute.xlu2 %391  ;;  %v961_v22 = vpop.permute.xlu1 %71 }
 0x117   :  { %v305_v55 = vadd.f32 %v304_v59, %v299_v42  ;;  %v75_v12 = vrot.slane %v746_v32, 4 }
 0x118   :  { %v274_v16 = vadd.f32 %v273_v0, %v267_v21 }
 0x119   :  { %v311_v43 = vadd.f32 %v310_v49, %v305_v55 }
 0x11a   :  { %v281_v25 = vadd.f32 %v280_v48, %v274_v16  ;;  %v330_v16 = vadd.f32 %v913_v30, %v886_v60 }
 0x11b   :  { %v317_v31 = vadd.f32 %v316_v34, %v311_v43 }
 0x11c   :  { %v288_v36 = vadd.f32 %v287_v27, %v281_v25  ;;  %v85_v25 = vmul.f32 %v83_v23, %v961_v22 }
 0x11d   :  { %v322_v56 = vadd.f32 %v886_v60, %v317_v31 }
 0x11e   :  { %v293_v26 = vadd.f32 %v841_v6, %v288_v36  ;;  %v944_v45 = vpop.permute.xlu2 %364 }
 0x120   :  { %641 = vtanh.f32 %v293_v26  ;;  %v77_v26 = vmul.f32 %v75_v12, %v961_v22 }
 0x126   :  { %v642_v50 = vpop.eup %641  ;;  %v967_v55 = vpop.permute.xlu2 %79 }
 0x127   :  { %v381_v51 = vperm.slane %v642_v50, 0  ;;  %v387_v13 = vperm.slane %v642_v50, 1  ;;  %v394_v28 = vperm.slane %v642_v50, 2  ;;  %v401_v29 = vperm.slane %v642_v50, 3 }
 0x128   :  { %v367_v2 = vmul.f32 %v642_v50, %v944_v45  ;;  %v86_v49 = vadd.f32 %v85_v25, %v967_v55 }
 0x129   :  { %v382_v19 = vmul.f32 %v381_v51, %v867_v4  ;;  %v388_v6 = vmul.f32 %v387_v13, %v931_v46  ;;  %v395_v41 = vmul.f32 %v394_v28, %v938_v1  ;;  %v402_v54 = vmul.f32 %v401_v29, %v946_v44 }
 0x12a   :  { %v369_v57 = vsel %vm368_vm0, %v367_v2, 0.0  ;;  %v82_v51 = vadd.f32 %v967_v55, %v77_v26  ;;  %v91_v26 = vrot.slane %v746_v32, 7 }
 0x12b   :  { %v389_v53 = vadd.f32 %v388_v6, %v382_v19  ;;  %v370_v39 = vrot.slane %v369_v57, 4 }
 0x12d   :  { %v396_v62 = vadd.f32 %v395_v41, %v389_v53  ;;  %v371_v3 = vadd.f32 %v370_v39, %v369_v57 }
 0x12f   :  { %v403_v24 = vadd.f32 %v402_v54, %v396_v62  ;;  %v372_v10 = vrot.slane %v371_v3, 2 }
 0x131   :  { %v404_v61 = vadd.f32 %v403_v24, %v322_v56  ;;  %v373_v21 = vadd.f32 %v372_v10, %v371_v3 }
 0x133   :  { %643 = vtanh.f32 %v404_v61  ;;  %v374_v59 = vrot.slane %v373_v21, 1  ;;  %v87_v61 = vrot.slane %v746_v32, 6 }
 0x135   :  { %v375_v43 = vadd.f32 %v374_v59, %v373_v21 }
 0x137   :  { %v376_v19 = vadd.f32 %v375_v43, %v82_v51  ;;  %v346_v51 = vadd.f32 %v884_v35, %v886_v60 }
 0x139   :  { %v644_v5 = vpop.eup %643 }
 0x13a   :  { %v415_v58 = vperm.slane %v644_v5, 0  ;;  %v417_v7 = vperm.slane %v644_v5, 1  ;;  %v420_v47 = vperm.slane %v644_v5, 2  ;;  %v406_v8 = vmul.f32 %v644_v5, %v944_v45 }
 0x13b   :  { %v423_v40 = vperm.slane %v644_v5, 3 }
 0x13c   :  { %v416_v37 = vmul.f32 %v415_v58, %v867_v4  ;;  %v418_v38 = vmul.f32 %v417_v7, %v931_v46  ;;  %v407_v11 = vsel %vm368_vm0, %v406_v8, 0.0  ;;  %v421_v15 = vmul.f32 %v420_v47, %v938_v1 }
 0x13d   :  { %v408_v17 = vrot.slane %v407_v11, 4  ;;  %v424_v63 = vmul.f32 %v423_v40, %v946_v44  ;;  %v338_v7 = vadd.f32 %v902_v9, %v886_v60  ;;  %v89_v8 = vmul.f32 %v87_v61, %v961_v22 }
 0x13e   :  { %v419_v14 = vadd.f32 %v418_v38, %v416_v37 }
 0x13f   :  { %v409_v0 = vadd.f32 %v408_v17, %v407_v11  ;;  %v90_v10 = vadd.f32 %v89_v8, %v967_v55  ;;  %v95_v8 = vmul.f32 %v961_v22, %v751_v33 }
 0x140   :  { %v422_v20 = vadd.f32 %v421_v15, %v419_v14 }
 0x141   :  { %v410_v27 = vrot.slane %v409_v0, 2 }
 0x142   :  { %v425_v48 = vadd.f32 %v424_v63, %v422_v20 }
 0x143   :  { %v411_v42 = vadd.f32 %v410_v27, %v409_v0 }
 0x144   :  { %v426_v36 = vadd.f32 %v425_v48, %v330_v16 }
 0x145   :  { %v412_v50 = vrot.slane %v411_v42, 1 }
 0x146   :  { %645 = vtanh.f32 %v426_v36 }
 0x147   :  { %v413_v13 = vadd.f32 %v412_v50, %v411_v42 }
 0x149   :  { %v414_v30 = vadd.f32 %v413_v13, %v86_v49  ;;  %v93_v13 = vmul.f32 %v91_v26, %v961_v22 }
 0x14b   :  { %v526_v34 = vrot.slane %v414_v30, 7 }
 0x14c   :  { %v646_v28 = vpop.eup %645 }
 0x14d   :  { %v437_v6 = vperm.slane %v646_v28, 0  ;;  %v439_v29 = vperm.slane %v646_v28, 1  ;;  %v442_v31 = vperm.slane %v646_v28, 2  ;;  %v428_v53 = vmul.f32 %v646_v28, %v944_v45 }
 0x14e   :  { %v544_v41 = vsel %vm543_vm1, %v376_v19, %v526_v34  ;;  %v445_v54 = vperm.slane %v646_v28, 3  ;;  %v94_v34 = vadd.f32 %v93_v13, %v967_v55 }
 0x14f   :  { %v438_v2 = vmul.f32 %v437_v6, %v867_v4  ;;  %v440_v62 = vmul.f32 %v439_v29, %v931_v46  ;;  %v429_v56 = vsel %vm368_vm0, %v428_v53, 0.0  ;;  %v443_v57 = vmul.f32 %v442_v31, %v938_v1 }
 0x150   :  { %v430_v39 = vrot.slane %v429_v56, 4  ;;  %v446_v5 = vmul.f32 %v445_v54, %v946_v44 }
 0x151   :  { %v441_v24 = vadd.f32 %v440_v62, %v438_v2 }
 0x152   :  { %v431_v58 = vadd.f32 %v430_v39, %v429_v56 }
 0x153   :  { %v444_v3 = vadd.f32 %v443_v57, %v441_v24 }
 0x154   :  { %v432_v37 = vrot.slane %v431_v58, 2 }
 0x155   :  { %v447_v47 = vadd.f32 %v446_v5, %v444_v3 }
 0x156   :  { %v433_v40 = vadd.f32 %v432_v37, %v431_v58 }
 0x157   :  { %v448_v38 = vadd.f32 %v447_v47, %v338_v7 }
 0x158   :  { %v434_v11 = vrot.slane %v433_v40, 1 }
 0x159   :  { %647 = vtanh.f32 %v448_v38 }
 0x15a   :  { %v435_v14 = vadd.f32 %v434_v11, %v433_v40 }
 0x15c   :  { %v436_v15 = vadd.f32 %v435_v14, %v90_v10  ;;  %v96_v10 = vadd.f32 %v95_v8, %v967_v55 }
 0x15e   :  { %v529_v17 = vrot.slane %v436_v15, 6 }
 0x15f   :  { %v648_v23 = vpop.eup %647 }
 0x160   :  { %v459_v12 = vperm.slane %v648_v23, 0  ;;  %v461_v20 = vperm.slane %v648_v23, 1  ;;  %v464_v63 = vperm.slane %v648_v23, 2  ;;  %v450_v9 = vmul.f32 %v648_v23, %v944_v45 }
 0x161   :  { %v546_v21 = vsel %vm545_vm2, %v544_v41, %v529_v17  ;;  %v467_v48 = vperm.slane %v648_v23, 3 }
 0x162   :  { %v460_v0 = vmul.f32 %v459_v12, %v867_v4  ;;  %v462_v16 = vmul.f32 %v461_v20, %v931_v46  ;;  %v451_v25 = vsel %vm368_vm0, %v450_v9, 0.0  ;;  %v465_v36 = vmul.f32 %v464_v63, %v938_v1 }
 0x163   :  { %v452_v59 = vrot.slane %v451_v25, 4  ;;  %v468_v49 = vmul.f32 %v467_v48, %v946_v44 }
 0x164   :  { %v463_v27 = vadd.f32 %v462_v16, %v460_v0 }
 0x165   :  { %v453_v50 = vadd.f32 %v452_v59, %v451_v25 }
 0x166   :  { %v466_v42 = vadd.f32 %v465_v36, %v463_v27  ;;  %v98_v36 = vrot.slane %v751_v33, 1 }
 0x167   :  { %v454_v30 = vrot.slane %v453_v50, 2 }
 0x168   :  { %v469_v43 = vadd.f32 %v468_v49, %v466_v42 }
 0x169   :  { %v455_v19 = vadd.f32 %v454_v30, %v453_v50 }
 0x16a   :  { %v470_v28 = vadd.f32 %v469_v43, %v346_v51 }
 0x16b   :  { %v456_v6 = vrot.slane %v455_v19, 1 }
 0x16c   :  { %649 = vtanh.f32 %v470_v28 }
 0x16d   :  { %v457_v29 = vadd.f32 %v456_v6, %v455_v19 }
 0x16f   :  { %v458_v32 = vadd.f32 %v457_v29, %v94_v34 }
 0x171   :  { %v532_v53 = vrot.slane %v458_v32, 5 }
 0x172   :  { %v650_v31 = vpop.eup %649 }
 0x173   :  { %v481_v41 = vperm.slane %v650_v31, 0  ;;  %v483_v2 = vperm.slane %v650_v31, 1  ;;  %v486_v62 = vperm.slane %v650_v31, 2  ;;  %v472_v35 = vmul.f32 %v650_v31, %v944_v45 }
 0x174   :  { %v548_v60 = vsel %vm547_vm3, %v546_v21, %v532_v53  ;;  %v489_v24 = vperm.slane %v650_v31, 3  ;;  %v102_v31 = vrot.slane %v751_v33, 2 }
 0x175   :  { %v482_v54 = vmul.f32 %v481_v41, %v867_v4  ;;  %v484_v56 = vmul.f32 %v483_v2, %v931_v46  ;;  %v473_v57 = vsel %vm368_vm0, %v472_v35, 0.0  ;;  %v487_v39 = vmul.f32 %v486_v62, %v938_v1 }
 0x176   :  { %v474_v3 = vrot.slane %v473_v57, 4  ;;  %v490_v58 = vmul.f32 %v489_v24, %v946_v44  ;;  %v104_v41 = vmul.f32 %v102_v31, %v961_v22 }
 0x177   :  { %v485_v61 = vadd.f32 %v484_v56, %v482_v54 }
 0x178   :  { %v475_v7 = vadd.f32 %v474_v3, %v473_v57  ;;  %v105_v35 = vadd.f32 %v104_v41, %v967_v55 }
 0x179   :  { %v488_v5 = vadd.f32 %v487_v39, %v485_v61 }
 0x17a   :  { %v476_v37 = vrot.slane %v475_v7, 2 }
 0x17b   :  { %v491_v47 = vadd.f32 %v490_v58, %v488_v5 }
 0x17c   :  { %v477_v40 = vadd.f32 %v476_v37, %v475_v7 }
 0x17d   :  { %v492_v38 = vadd.f32 %v491_v47, %v889_v52 }
 0x17e   :  { %v478_v11 = vrot.slane %v477_v40, 1 }
 0x17f   :  { %651 = vtanh.f32 %v492_v38 }
 0x180   :  { %v479_v14 = vadd.f32 %v478_v11, %v477_v40 }
 0x182   :  { %v480_v15 = vadd.f32 %v479_v14, %v96_v10 }
 0x184   :  { %v535_v9 = vrot.slane %v480_v15, 4 }
 0x185   :  { %v652_v23 = vpop.eup %651 }
 0x186   :  { %v503_v17 = vperm.slane %v652_v23, 0  ;;  %v505_v12 = vperm.slane %v652_v23, 1  ;;  %v508_v20 = vperm.slane %v652_v23, 2  ;;  %v494_v63 = vmul.f32 %v652_v23, %v944_v45 }
 0x187   :  { %v511_v16 = vperm.slane %v652_v23, 3  ;;  %v549_v48 = vsel %vm368_vm0, %v548_v60, %v535_v9 }
 0x188   :  { %v504_v21 = vmul.f32 %v503_v17, %v867_v4  ;;  %v506_v0 = vmul.f32 %v505_v12, %v931_v46  ;;  %v495_v52 = vsel %vm368_vm0, %v494_v63, 0.0  ;;  %v509_v27 = vmul.f32 %v508_v20, %v938_v1 }
 0x189   :  { %v496_v26 = vrot.slane %v495_v52, 4  ;;  %v512_v42 = vmul.f32 %v511_v16, %v946_v44  ;;  %v100_v4 = vmul.f32 %v98_v36, %v961_v22 }
 0x18a   :  { %v507_v25 = vadd.f32 %v506_v0, %v504_v21 }
 0x18b   :  { %v497_v49 = vadd.f32 %v496_v26, %v495_v52  ;;  %v101_v13 = vadd.f32 %v100_v4, %v967_v55 }
 0x18c   :  { %v510_v59 = vadd.f32 %v509_v27, %v507_v25 }
 0x18d   :  { %v498_v51 = vrot.slane %v497_v49, 2 }
 0x18e   :  { %v513_v50 = vadd.f32 %v512_v42, %v510_v59 }
 0x18f   :  { %v499_v43 = vadd.f32 %v498_v51, %v497_v49 }
 0x190   :  { %v514_v46 = vadd.f32 %v513_v50, %v892_v18 }
 0x191   :  { %v500_v30 = vrot.slane %v499_v43, 1 }
 0x192   :  { %653 = vtanh.f32 %v514_v46 }
 0x193   :  { %v501_v28 = vadd.f32 %v500_v30, %v499_v43 }
 0x195   :  { %v502_v1 = vadd.f32 %v501_v28, %v101_v13 }
 0x197   :  { %v538_v34 = vrot.slane %v502_v1, 3 }
 0x198   :  { %v654_v19 = vpop.eup %653 }
 0x199   :  { %v516_v6 = vmul.f32 %v654_v19, %v944_v45  ;;  %v551_v44 = vsel %vm550_vm4, %v549_v48, %v538_v34 }
 0x19b   :  { %v517_v29 = vsel %vm368_vm0, %v516_v6, 0.0 }
 0x19c   :  { %v518_v32 = vrot.slane %v517_v29, 4 }
 0x19e   :  { %v519_v53 = vadd.f32 %v518_v32, %v517_v29 }
 0x1a0   :  { %v520_v18 = vrot.slane %v519_v53, 2 }
 0x1a2   :  { %v521_v2 = vadd.f32 %v520_v18, %v519_v53 }
 0x1a4   :  { %v522_v62 = vrot.slane %v521_v2, 1 }
 0x1a6   :  { %v523_v60 = vadd.f32 %v522_v62, %v521_v2 }
 0x1a8   :  { %v524_v54 = vadd.f32 %v523_v60, %v105_v35 }
 0x1aa   :  { %v541_v56 = vrot.slane %v524_v54, 2 }
 0x1ac   :  { %v553_v24 = vsel %vm552_vm5, %v551_v44, %v541_v56 }
 0x1ad   :  { %554 = vst [vmem:[%s1024_s2] sm:$0x7f] %v553_v24 }

</bundles_post_ra>
